<compile_context>
chip_gen: v5e
topology: v5e:2x2
jax: 0.10.0
libtpu: 0.0.40
codegen_flags: <defaults>
</compile_context>

<pallas_src>
import numpy as np
import jax
import jax.numpy as jnp
from jax import lax
from jax.experimental import pallas as pl
from jax.experimental.pallas import tpu as pltpu

EPS = 1e-5


# ----------------------------- Pallas kernels -----------------------------

def _make_conv_kernel(offsets, hs, nb, fuse_affine):
    """3x3 circular conv for `nb` samples: one (Cout, 9*Cp) @ (9*Cp, H*S) MXU
    contraction per sample, taps built in-kernel from a single circularly
    padded copy of the input (every tap is a static lane slice of the
    flattened padded image, row stride S=W+2).

    refs (in order):
      x_ref:    (nb, Cp, LFLAT)  padded input; bf16 for conv1, f32 for conv2
      w_ref:    (Cout, 9*Cp)     bf16 weights; tap k at cols [k*Cp, (k+1)*Cp)
      mask_ref: (1, H*S)         1.0 on valid output columns (w < W)
      [s_ref, t_ref: (Cp, 1)]    folded BN1 affine (fused with ReLU, conv2 only)
      y_ref:    (nb, Cout, H*S)  raw conv output (junk in masked columns), f32
      st_ref:   (1, Cout, 2)     packed per-channel [sum, sum_sq] over this step
    """

    def kernel(*refs):
        if fuse_affine:
            x_ref, w_ref, mask_ref, s_ref, t_ref, y_ref, st_ref = refs
        else:
            x_ref, w_ref, mask_ref, y_ref, st_ref = refs

        wmat = w_ref[...]          # (Cout, 9*Cp) bf16, grid-invariant
        m = mask_ref[...]          # (1, H*S) f32

        sum_acc = None
        ssq_acc = None
        for b in range(nb):        # static, short, unrolled loop over samples
            if fuse_affine:
                # fused BN(prev) affine + ReLU in f32, then cast ONCE to bf16
                # *before* the 9 tap slices (halves the tap-staging copies).
                xb = jnp.maximum(x_ref[b] * s_ref[...] + t_ref[...], 0.0)
                xb = xb.astype(jnp.bfloat16)
            else:
                xb = x_ref[b]      # already bf16 from the wrapper

            # 9 shifted taps (static lane slices) -> one K = 9*Cp contraction.
            # (On v7x the MRB would allow 9 accumulating K=Cp dots instead.)
            taps = jnp.concatenate([xb[:, o:o + hs] for o in offsets], axis=0)
            y = jnp.dot(wmat, taps, preferred_element_type=jnp.float32)  # (Cout, H*S)
            y_ref[b] = y

            ym = y * m
            sb = jnp.sum(ym, axis=-1, keepdims=True)       # (Cout, 1)
            qb = jnp.sum(ym * y, axis=-1, keepdims=True)   # (Cout, 1)
            sum_acc = sb if sum_acc is None else sum_acc + sb
            ssq_acc = qb if ssq_acc is None else ssq_acc + qb

        st_ref[0] = jnp.concatenate([sum_acc, ssq_acc], axis=-1)  # (Cout, 2)

    return kernel


def _make_pool_kernel(nb):
    """Folded BN2 affine + ReLU + 2x2 max pool for `nb` samples.

    y_ref is laid out as super-rows: each sublane row holds two consecutive
    image rows on the lane axis (2*S lanes), so every 2x2 pool cell is 4 lanes
    of the same row.  The 4 phases are picked with tiny (2S, W/2) one-hot
    selectors (O(W^2) total, independent of H) and max-combined.

    refs: y_ref (nb, C*H/2, 2S) f32, s_ref/t_ref (C*H/2, 1) f32,
          sel_ref (4, 2S, W/2) f32, o_ref (nb, C*H/2, W/2) f32.
    """

    def kernel(y_ref, s_ref, t_ref, sel_ref, o_ref):
        sc = s_ref[...]
        sh = t_ref[...]
        for b in range(nb):
            a = jnp.maximum(y_ref[b] * sc + sh, 0.0)        # (C*H2, 2S)
            p0 = jnp.dot(a, sel_ref[0], preferred_element_type=jnp.float32)
            p1 = jnp.dot(a, sel_ref[1], preferred_element_type=jnp.float32)
            p2 = jnp.dot(a, sel_ref[2], preferred_element_type=jnp.float32)
            p3 = jnp.dot(a, sel_ref[3], preferred_element_type=jnp.float32)
            o_ref[b] = jnp.maximum(jnp.maximum(p0, p1), jnp.maximum(p2, p3))

    return kernel


# ------------------------------- wrappers ----------------------------------

def _valid_mask(h, w):
    s = w + 2
    row = np.concatenate([np.ones((w,), np.float32), np.zeros((s - w,), np.float32)])
    return jnp.asarray(np.tile(row, h)[None, :])            # (1, h*s)


def _pool_selectors(s, w2):
    """(4, 2S, W2) one-hot phase selectors for the super-row pool layout."""
    sel = np.zeros((4, 2 * s, w2), np.float32)
    for k, off in enumerate((0, 1, s, s + 1)):
        for j in range(w2):
            sel[k, off + 2 * j, j] = 1.0
    return jnp.asarray(sel)


def _conv_vmem_per_sample_bytes(c, cout, h, w):
    cp = -(-c // 8) * 8
    s = w + 2
    # padded-input block + output block + bf16 tap staging buffer
    return cp * ((h + 2) * s + 2) * 4 + cout * h * s * 4 + 9 * cp * h * s * 2


def _pick_nb(n, per_sample_bytes, budget_bytes=6 << 20, max_nb=16):
    """Samples per grid step.  Conservative VMEM budget so double-buffered
    blocks fit the default scoped limits on every generation (v5e 16MiB,
    v6e 32MiB, v7x 32-of-64MiB); keep >= 2 grid steps when possible so v7x's
    two TensorCores both get work.  On v6e a larger budget (raise
    vmem_limit_bytes) allows 2-4x bigger nb."""
    cap = max(1, budget_bytes // max(per_sample_bytes, 1))
    nb = max(1, min(n // 2 if n > 1 else 1, cap, max_nb))
    while n % nb:
        nb -= 1
    return nb


def _conv_layer(x_img, w_hwio, nb, scale=None, shift=None):
    """x_img: (N, C, H, W) f32 raw feature map (pre-affine when scale given).

    Returns (y, stats): y in padded-row flat layout (N, Cout, H*(W+2)) f32,
    stats (steps, Cout, 2) = per-grid-step per-channel [sum, sum_sq] over the
    valid columns (BN batch statistics)."""
    n, c, h, w = x_img.shape
    cout = w_hwio.shape[-1]
    cp = -(-c // 8) * 8                     # pad channels to a full sublane tile
    s = w + 2
    hs = h * s
    lflat = (h + 2) * s + 2                 # +2 keeps the (dy=2,dx=2) tap slice in bounds
    offsets = tuple(dy * s + dx for dy in range(3) for dx in range(3))
    fuse = scale is not None
    steps = n // nb
    assert steps * nb == n

    # single circularly-padded copy of the input (~1.3x), flattened row-major
    xp = jnp.pad(x_img, ((0, 0), (0, 0), (1, 1), (1, 1)), mode="wrap")
    xp = xp.reshape(n, c, (h + 2) * s)
    xp = jnp.pad(xp, ((0, 0), (0, cp - c), (0, lflat - (h + 2) * s)))
    if not fuse:
        # conv1: ship the input in bf16 (halves the HBM->VMEM DMA; the MXU
        # operand is bf16 anyway).  conv2 stays f32: the fused BN1 affine is
        # applied in f32 inside the kernel before the bf16 cast.
        xp = xp.astype(jnp.bfloat16)

    # weights (3,3,Cin,Cout) -> (Cout, 9*Cp) bf16; col index = (dy*3+dx)*Cp + ci
    w2d = jnp.transpose(w_hwio, (3, 0, 1, 2))
    w2d = jnp.pad(w2d, ((0, 0), (0, 0), (0, 0), (0, cp - c)))
    w2d = w2d.reshape(cout, 9 * cp).astype(jnp.bfloat16)

    mask = _valid_mask(h, w)

    inputs = [xp, w2d, mask]
    in_specs = [
        pl.BlockSpec((nb, cp, lflat), lambda i: (i, 0, 0)),
        pl.BlockSpec((cout, 9 * cp), lambda i: (0, 0)),
        pl.BlockSpec((1, hs), lambda i: (0, 0)),
    ]
    if fuse:
        sc = jnp.pad(scale.reshape(c, 1), ((0, cp - c), (0, 0)))
        sh = jnp.pad(shift.reshape(c, 1), ((0, cp - c), (0, 0)))
        inputs += [sc, sh]
        in_specs += [pl.BlockSpec((cp, 1), lambda i: (0, 0)),
                     pl.BlockSpec((cp, 1), lambda i: (0, 0))]

    y, stats = pl.pallas_call(
        _make_conv_kernel(offsets, hs, nb, fuse),
        out_shape=(jax.ShapeDtypeStruct((n, cout, hs), jnp.float32),
                   jax.ShapeDtypeStruct((steps, cout, 2), jnp.float32)),
        grid=(steps,),
        in_specs=in_specs,
        out_specs=(pl.BlockSpec((nb, cout, hs), lambda i: (i, 0, 0)),
                   pl.BlockSpec((1, cout, 2), lambda i: (i, 0, 0))),
        compiler_params=pltpu.CompilerParams(dimension_semantics=("parallel",)),
    )(*inputs)
    return y, stats


def _bn_params(stats, gamma, beta, count):
    """Fold training-mode BN (batch mean, biased var) into per-channel scale/shift."""
    tot = jnp.sum(stats, axis=0)                       # (Cout, 2)
    mean = tot[:, 0] / count
    # one-pass E[y^2]-mean^2 (clamped); fine for zero-mean-ish conv outputs.
    var = jnp.maximum(tot[:, 1] / count - mean * mean, 0.0)
    scale = gamma / jnp.sqrt(var + EPS)
    shift = beta - mean * scale
    return scale, shift


def _bn_relu_maxpool(y_flat, scale, shift, h, w, nb):
    n, cout, hs = y_flat.shape
    s = w + 2
    h2, w2 = h // 2, w // 2
    steps = n // nb

    # free reshape: each super-row = two consecutive image rows on the lane axis
    y3 = y_flat.reshape(n, cout * h2, 2 * s)
    sc = jnp.repeat(scale, h2).reshape(cout * h2, 1)
    sh = jnp.repeat(shift, h2).reshape(cout * h2, 1)
    sel = _pool_selectors(s, w2)                       # (4, 2S, W2), tiny

    out = pl.pallas_call(
        _make_pool_kernel(nb),
        out_shape=jax.ShapeDtypeStruct((n, cout * h2, w2), jnp.float32),
        grid=(steps,),
        in_specs=[pl.BlockSpec((nb, cout * h2, 2 * s), lambda i: (i, 0, 0)),
                  pl.BlockSpec((cout * h2, 1), lambda i: (0, 0)),
                  pl.BlockSpec((cout * h2, 1), lambda i: (0, 0)),
                  pl.BlockSpec((4, 2 * s, w2), lambda i: (0, 0, 0))],
        out_specs=pl.BlockSpec((nb, cout * h2, w2), lambda i: (i, 0, 0)),
        compiler_params=pltpu.CompilerParams(dimension_semantics=("parallel",)),
    )(y3, sc, sh, sel)
    return out.reshape(n, cout, h2, w2)


# ------------------------------ CNNBlock -----------------------------------

def init_params(key, in_ch, out_ch):
    k1, k2, k3, k4 = jax.random.split(key, 4)

    def xavier(k, cin, cout):  # xavier_uniform_ on conv weight (fan = 9*ch)
        bound = (6.0 / (cin * 9 + cout * 9)) ** 0.5
        return jax.random.uniform(k, (3, 3, cin, cout), jnp.float32, -bound, bound)

    def bias(k, cin, cout):    # PyTorch Conv2d default bias init
        bound = 1.0 / (cin * 9) ** 0.5
        return jax.random.uniform(k, (cout,), jnp.float32, -bound, bound)

    return dict(
        w1=xavier(k1, in_ch, out_ch), b1=bias(k2, in_ch, out_ch),
        w2=xavier(k3, out_ch, out_ch), b2=bias(k4, out_ch, out_ch),
        gamma1=jnp.ones((out_ch,), jnp.float32), beta1=jnp.zeros((out_ch,), jnp.float32),
        gamma2=jnp.ones((out_ch,), jnp.float32), beta2=jnp.zeros((out_ch,), jnp.float32),
    )


def cnn_block_forward(x_nchw, p, nb=None):
    n, _, h, w = x_nchw.shape
    assert h % 2 == 0 and w % 2 == 0, "MaxPool2d(2) requires even H and W"
    cout = p["w1"].shape[-1]
    if nb is None:
        nb = _pick_nb(n, _conv_vmem_per_sample_bytes(cout, cout, h, w))
    cnt = n * h * w
    s = w + 2

    # conv1 (+ BN1 batch stats emitted by the kernel).  Conv bias cancels in
    # training-mode BN (y - mean), so it is dropped.
    y1, st1 = _conv_layer(x_nchw, p["w1"], nb)
    sc1, sh1 = _bn_params(st1, p["gamma1"], p["beta1"], cnt)

    # re-wrap y1 for the next circular conv (cheap XLA glue on the small map).
    y1_img = y1.reshape(n, cout, h, s)[:, :, :, :w]

    # conv2 with BN1 affine + ReLU fused on its input (+ BN2 stats).
    y2, st2 = _conv_layer(y1_img, p["w2"], nb, scale=sc1, shift=sh1)
    sc2, sh2 = _bn_params(st2, p["gamma2"], p["beta2"], cnt)

    # BN2 affine + ReLU + 2x2 max pool in one kernel.  Output is NCHW.
    return _bn_relu_maxpool(y2, sc2, sh2, h, w, nb)


# ----------------------- pure-JAX reference (for check) --------------------

def reference_forward(x_nchw, p):
    def conv(x, wt, b):
        xp = jnp.pad(x, ((0, 0), (0, 0), (1, 1), (1, 1)), mode="wrap")
        w_oihw = jnp.transpose(wt, (3, 2, 0, 1))
        y = lax.conv_general_dilated(xp, w_oihw, (1, 1), "VALID",
                                     dimension_numbers=("NCHW", "OIHW", "NCHW"))
        return y + b[None, :, None, None]

    def bn_relu_ref(y, g, bt):
        m = jnp.mean(y, axis=(0, 2, 3), keepdims=True)
        v = jnp.mean((y - m) ** 2, axis=(0, 2, 3), keepdims=True)
        return jnp.maximum((y - m) / jnp.sqrt(v + EPS) * g[None, :, None, None]
                           + bt[None, :, None, None], 0.0)

    z1 = bn_relu_ref(conv(x_nchw, p["w1"], p["b1"]), p["gamma1"], p["beta1"])
    z2 = bn_relu_ref(conv(z1, p["w2"], p["b2"]), p["gamma2"], p["beta2"])
    n, c, h, w = z2.shape
    return z2.reshape(n, c, h // 2, 2, w // 2, 2).max(axis=(3, 5))


if __name__ == "__main__":
    key = jax.random.PRNGKey(0)
    kx, kp = jax.random.split(key)
    N, IN_CH, OUT_CH, H, W = 4, 4, 8, 16, 16   # N=4 exercises nb=2 batching + 2 grid steps

    x = jax.random.normal(kx, (N, IN_CH, H, W), jnp.float32)
    params = init_params(kp, IN_CH, OUT_CH)

    out = jax.jit(cnn_block_forward)(x, params)
    out = jax.block_until_ready(out)

    ref = reference_forward(x, params)
    assert out.shape == (N, OUT_CH, H // 2, W // 2), out.shape
    err = float(jnp.max(jnp.abs(out - ref)))
    # bf16 MXU operands (f32 accumulate) -> slightly looser tolerance than pure f32.
    assert jnp.allclose(out, ref, rtol=3e-2, atol=3e-2), err

    print("KERNEL_OK")
</pallas_src>

<mosaic_0001>
module attributes {stable_mosaic.version = 11 : i64} {
  func.func @kernel(%arg0: i32, %arg1: memref<2x8x326xbf16, #tpu.memory_space<vmem>>, %arg2: memref<8x72xbf16, #tpu.memory_space<vmem>>, %arg3: memref<1x288xf32, #tpu.memory_space<vmem>>, %arg4: memref<2x8x288xf32, #tpu.memory_space<vmem>>, %arg5: memref<1x8x2xf32, #tpu.memory_space<vmem>>) attributes {dimension_semantics = [#tpu.dimension_semantics<parallel>], iteration_bounds = array<i64: 2>, scalar_prefetch = 0 : i64, scratch_operands = 0 : i64, tpu.core_type = #tpu.core_type<tc>, window_params = [{transform_indices = @transform_0, window_bounds = array<i64: 2, 8, 326>}, {pipeline_mode = #tpu.pipeline_mode<synchronous>, transform_indices = @transform_1, window_bounds = array<i64: 8, 72>}, {pipeline_mode = #tpu.pipeline_mode<synchronous>, transform_indices = @transform_2, window_bounds = array<i64: 1, 288>}, {transform_indices = @transform_3, window_bounds = array<i64: 2, 8, 288>}, {transform_indices = @transform_4, window_bounds = array<i64: 1, 8, 2>}]} {
    %c0 = arith.constant 0 : index
    %c0_0 = arith.constant 0 : index
    %0 = vector.load %arg2[%c0, %c0_0] : memref<8x72xbf16, #tpu.memory_space<vmem>>, vector<8x72xbf16>
    %c0_1 = arith.constant 0 : index
    %c0_2 = arith.constant 0 : index
    %1 = vector.load %arg3[%c0_1, %c0_2] : memref<1x288xf32, #tpu.memory_space<vmem>>, vector<1x288xf32>
    %c0_3 = arith.constant 0 : index
    %c0_4 = arith.constant 0 : index
    %c0_5 = arith.constant 0 : index
    %2 = vector.load %arg1[%c0_3, %c0_4, %c0_5] : memref<2x8x326xbf16, #tpu.memory_space<vmem>>, vector<1x8x326xbf16>
    %3 = vector.shape_cast %2 : vector<1x8x326xbf16> to vector<8x326xbf16>
    %4 = vector.extract_strided_slice %3 {offsets = [0, 0], sizes = [8, 288], strides = [1, 1]} : vector<8x326xbf16> to vector<8x288xbf16>
    %5 = vector.extract_strided_slice %3 {offsets = [0, 1], sizes = [8, 288], strides = [1, 1]} : vector<8x326xbf16> to vector<8x288xbf16>
    %6 = vector.extract_strided_slice %3 {offsets = [0, 2], sizes = [8, 288], strides = [1, 1]} : vector<8x326xbf16> to vector<8x288xbf16>
    %7 = vector.extract_strided_slice %3 {offsets = [0, 18], sizes = [8, 288], strides = [1, 1]} : vector<8x326xbf16> to vector<8x288xbf16>
    %8 = vector.extract_strided_slice %3 {offsets = [0, 19], sizes = [8, 288], strides = [1, 1]} : vector<8x326xbf16> to vector<8x288xbf16>
    %9 = vector.extract_strided_slice %3 {offsets = [0, 20], sizes = [8, 288], strides = [1, 1]} : vector<8x326xbf16> to vector<8x288xbf16>
    %10 = vector.extract_strided_slice %3 {offsets = [0, 36], sizes = [8, 288], strides = [1, 1]} : vector<8x326xbf16> to vector<8x288xbf16>
    %11 = vector.extract_strided_slice %3 {offsets = [0, 37], sizes = [8, 288], strides = [1, 1]} : vector<8x326xbf16> to vector<8x288xbf16>
    %12 = vector.extract_strided_slice %3 {offsets = [0, 38], sizes = [8, 288], strides = [1, 1]} : vector<8x326xbf16> to vector<8x288xbf16>
    %13 = tpu.concatenate %4, %5, %6, %7, %8, %9, %10, %11, %12 in 0 : vector<8x288xbf16>, vector<8x288xbf16>, vector<8x288xbf16>, vector<8x288xbf16>, vector<8x288xbf16>, vector<8x288xbf16>, vector<8x288xbf16>, vector<8x288xbf16>, vector<8x288xbf16> -> vector<72x288xbf16>
    %cst = arith.constant dense<0.000000e+00> : vector<8x288xf32>
    %14 = tpu.matmul %0, %13, %cst {dimension_numbers = #tpu.dot_dimension_numbers<[1], [0], [0], [1], [0, 0, 1, 1], [], []>} : vector<8x72xbf16>, vector<72x288xbf16>, vector<8x288xf32> -> vector<8x288xf32>
    %c0_6 = arith.constant 0 : index
    %c0_7 = arith.constant 0 : index
    %c0_8 = arith.constant 0 : index
    %15 = vector.load %arg4[%c0_6, %c0_7, %c0_8] : memref<2x8x288xf32, #tpu.memory_space<vmem>>, vector<1x8x288xf32>
    %16 = vector.shape_cast %15 : vector<1x8x288xf32> to vector<8x288xf32>
    %17 = vector.shape_cast %14 : vector<8x288xf32> to vector<1x8x288xf32>
    tpu.vector_store %arg4[%c0_6, %c0_7, %c0_8], %17 {strides = array<i32>} : memref<2x8x288xf32, #tpu.memory_space<vmem>>, vector<1x8x288xf32>,
    %18 = vector.broadcast %1 : vector<1x288xf32> to vector<8x288xf32>
    %19 = arith.mulf %14, %18 : vector<8x288xf32>
    %cst_9 = arith.constant dense<0.000000e+00> : vector<8xf32>
    %20 = vector.multi_reduction <add>, %19, %cst_9 [1] : vector<8x288xf32> to vector<8xf32>
    %21 = vector.shape_cast %20 : vector<8xf32> to vector<8x1xf32>
    %22 = arith.mulf %19, %14 : vector<8x288xf32>
    %cst_10 = arith.constant dense<0.000000e+00> : vector<8xf32>
    %23 = vector.multi_reduction <add>, %22, %cst_10 [1] : vector<8x288xf32> to vector<8xf32>
    %24 = vector.shape_cast %23 : vector<8xf32> to vector<8x1xf32>
    %c1 = arith.constant 1 : index
    %c0_11 = arith.constant 0 : index
    %c0_12 = arith.constant 0 : index
    %25 = vector.load %arg1[%c1, %c0_11, %c0_12] : memref<2x8x326xbf16, #tpu.memory_space<vmem>>, vector<1x8x326xbf16>
    %26 = vector.shape_cast %25 : vector<1x8x326xbf16> to vector<8x326xbf16>
    %27 = vector.extract_strided_slice %26 {offsets = [0, 0], sizes = [8, 288], strides = [1, 1]} : vector<8x326xbf16> to vector<8x288xbf16>
    %28 = vector.extract_strided_slice %26 {offsets = [0, 1], sizes = [8, 288], strides = [1, 1]} : vector<8x326xbf16> to vector<8x288xbf16>
    %29 = vector.extract_strided_slice %26 {offsets = [0, 2], sizes = [8, 288], strides = [1, 1]} : vector<8x326xbf16> to vector<8x288xbf16>
    %30 = vector.extract_strided_slice %26 {offsets = [0, 18], sizes = [8, 288], strides = [1, 1]} : vector<8x326xbf16> to vector<8x288xbf16>
    %31 = vector.extract_strided_slice %26 {offsets = [0, 19], sizes = [8, 288], strides = [1, 1]} : vector<8x326xbf16> to vector<8x288xbf16>
    %32 = vector.extract_strided_slice %26 {offsets = [0, 20], sizes = [8, 288], strides = [1, 1]} : vector<8x326xbf16> to vector<8x288xbf16>
    %33 = vector.extract_strided_slice %26 {offsets = [0, 36], sizes = [8, 288], strides = [1, 1]} : vector<8x326xbf16> to vector<8x288xbf16>
    %34 = vector.extract_strided_slice %26 {offsets = [0, 37], sizes = [8, 288], strides = [1, 1]} : vector<8x326xbf16> to vector<8x288xbf16>
    %35 = vector.extract_strided_slice %26 {offsets = [0, 38], sizes = [8, 288], strides = [1, 1]} : vector<8x326xbf16> to vector<8x288xbf16>
    %36 = tpu.concatenate %27, %28, %29, %30, %31, %32, %33, %34, %35 in 0 : vector<8x288xbf16>, vector<8x288xbf16>, vector<8x288xbf16>, vector<8x288xbf16>, vector<8x288xbf16>, vector<8x288xbf16>, vector<8x288xbf16>, vector<8x288xbf16>, vector<8x288xbf16> -> vector<72x288xbf16>
    %cst_13 = arith.constant dense<0.000000e+00> : vector<8x288xf32>
    %37 = tpu.matmul %0, %36, %cst_13 {dimension_numbers = #tpu.dot_dimension_numbers<[1], [0], [0], [1], [0, 0, 1, 1], [], []>} : vector<8x72xbf16>, vector<72x288xbf16>, vector<8x288xf32> -> vector<8x288xf32>
    %c1_14 = arith.constant 1 : index
    %c0_15 = arith.constant 0 : index
    %c0_16 = arith.constant 0 : index
    %38 = vector.load %arg4[%c1_14, %c0_15, %c0_16] : memref<2x8x288xf32, #tpu.memory_space<vmem>>, vector<1x8x288xf32>
    %39 = vector.shape_cast %38 : vector<1x8x288xf32> to vector<8x288xf32>
    %40 = vector.shape_cast %37 : vector<8x288xf32> to vector<1x8x288xf32>
    tpu.vector_store %arg4[%c1_14, %c0_15, %c0_16], %40 {strides = array<i32>} : memref<2x8x288xf32, #tpu.memory_space<vmem>>, vector<1x8x288xf32>,
    %41 = vector.broadcast %1 : vector<1x288xf32> to vector<8x288xf32>
    %42 = arith.mulf %37, %41 : vector<8x288xf32>
    %cst_17 = arith.constant dense<0.000000e+00> : vector<8xf32>
    %43 = vector.multi_reduction <add>, %42, %cst_17 [1] : vector<8x288xf32> to vector<8xf32>
    %44 = vector.shape_cast %43 : vector<8xf32> to vector<8x1xf32>
    %45 = arith.mulf %42, %37 : vector<8x288xf32>
    %cst_18 = arith.constant dense<0.000000e+00> : vector<8xf32>
    %46 = vector.multi_reduction <add>, %45, %cst_18 [1] : vector<8x288xf32> to vector<8xf32>
    %47 = vector.shape_cast %46 : vector<8xf32> to vector<8x1xf32>
    %48 = arith.addf %21, %44 : vector<8x1xf32>
    %49 = arith.addf %24, %47 : vector<8x1xf32>
    %50 = tpu.concatenate %48, %49 in 1 : vector<8x1xf32>, vector<8x1xf32> -> vector<8x2xf32>
    %c0_19 = arith.constant 0 : index
    %c0_20 = arith.constant 0 : index
    %c0_21 = arith.constant 0 : index
    %51 = vector.load %arg5[%c0_19, %c0_20, %c0_21] : memref<1x8x2xf32, #tpu.memory_space<vmem>>, vector<1x8x2xf32>
    %52 = vector.shape_cast %51 : vector<1x8x2xf32> to vector<8x2xf32>
    %53 = vector.shape_cast %50 : vector<8x2xf32> to vector<1x8x2xf32>
    tpu.vector_store %arg5[%c0_19, %c0_20, %c0_21], %53 {strides = array<i32>} : memref<1x8x2xf32, #tpu.memory_space<vmem>>, vector<1x8x2xf32>,
    return
  }
  func.func @transform_0(%arg0: i32) -> (i32, i32, i32) {
    %c0_i32 = arith.constant 0 : i32
    %c0_i32_0 = arith.constant 0 : i32
    %c0_i32_1 = arith.constant 0 : i32
    return %arg0, %c0_i32, %c0_i32_0 : i32, i32, i32
  }
  func.func @transform_1(%arg0: i32) -> (i32, i32) {
    %c0_i32 = arith.constant 0 : i32
    %c0_i32_0 = arith.constant 0 : i32
    %c0_i32_1 = arith.constant 0 : i32
    return %c0_i32, %c0_i32_0 : i32, i32
  }
  func.func @transform_2(%arg0: i32) -> (i32, i32) {
    %c0_i32 = arith.constant 0 : i32
    %c0_i32_0 = arith.constant 0 : i32
    %c0_i32_1 = arith.constant 0 : i32
    return %c0_i32, %c0_i32_0 : i32, i32
  }
  func.func @transform_3(%arg0: i32) -> (i32, i32, i32) {
    %c0_i32 = arith.constant 0 : i32
    %c0_i32_0 = arith.constant 0 : i32
    %c0_i32_1 = arith.constant 0 : i32
    return %arg0, %c0_i32, %c0_i32_0 : i32, i32, i32
  }
  func.func @transform_4(%arg0: i32) -> (i32, i32, i32) {
    %c0_i32 = arith.constant 0 : i32
    %c0_i32_0 = arith.constant 0 : i32
    %c0_i32_1 = arith.constant 0 : i32
    return %arg0, %c0_i32, %c0_i32_0 : i32, i32, i32
  }
}

module attributes {stable_mosaic.version = 11 : i64} {
  func.func @kernel(%arg0: i32, %arg1: memref<2x8x326xf32, #tpu.memory_space<vmem>>, %arg2: memref<8x72xbf16, #tpu.memory_space<vmem>>, %arg3: memref<1x288xf32, #tpu.memory_space<vmem>>, %arg4: memref<8x1xf32, #tpu.memory_space<vmem>>, %arg5: memref<8x1xf32, #tpu.memory_space<vmem>>, %arg6: memref<2x8x288xf32, #tpu.memory_space<vmem>>, %arg7: memref<1x8x2xf32, #tpu.memory_space<vmem>>) attributes {dimension_semantics = [#tpu.dimension_semantics<parallel>], iteration_bounds = array<i64: 2>, scalar_prefetch = 0 : i64, scratch_operands = 0 : i64, tpu.core_type = #tpu.core_type<tc>, window_params = [{transform_indices = @transform_0, window_bounds = array<i64: 2, 8, 326>}, {pipeline_mode = #tpu.pipeline_mode<synchronous>, transform_indices = @transform_1, window_bounds = array<i64: 8, 72>}, {pipeline_mode = #tpu.pipeline_mode<synchronous>, transform_indices = @transform_2, window_bounds = array<i64: 1, 288>}, {pipeline_mode = #tpu.pipeline_mode<synchronous>, transform_indices = @transform_3, window_bounds = array<i64: 8, 1>}, {pipeline_mode = #tpu.pipeline_mode<synchronous>, transform_indices = @transform_4, window_bounds = array<i64: 8, 1>}, {transform_indices = @transform_5, window_bounds = array<i64: 2, 8, 288>}, {transform_indices = @transform_6, window_bounds = array<i64: 1, 8, 2>}]} {
    %c0 = arith.constant 0 : index
    %c0_0 = arith.constant 0 : index
    %0 = vector.load %arg2[%c0, %c0_0] : memref<8x72xbf16, #tpu.memory_space<vmem>>, vector<8x72xbf16>
    %c0_1 = arith.constant 0 : index
    %c0_2 = arith.constant 0 : index
    %1 = vector.load %arg3[%c0_1, %c0_2] : memref<1x288xf32, #tpu.memory_space<vmem>>, vector<1x288xf32>
    %c0_3 = arith.constant 0 : index
    %c0_4 = arith.constant 0 : index
    %c0_5 = arith.constant 0 : index
    %2 = vector.load %arg1[%c0_3, %c0_4, %c0_5] : memref<2x8x326xf32, #tpu.memory_space<vmem>>, vector<1x8x326xf32>
    %3 = vector.shape_cast %2 : vector<1x8x326xf32> to vector<8x326xf32>
    %c0_6 = arith.constant 0 : index
    %c0_7 = arith.constant 0 : index
    %4 = vector.load %arg4[%c0_6, %c0_7] : memref<8x1xf32, #tpu.memory_space<vmem>>, vector<8x1xf32>
    %5 = vector.broadcast %4 : vector<8x1xf32> to vector<8x326xf32>
    %6 = arith.mulf %3, %5 : vector<8x326xf32>
    %c0_8 = arith.constant 0 : index
    %c0_9 = arith.constant 0 : index
    %7 = vector.load %arg5[%c0_8, %c0_9] : memref<8x1xf32, #tpu.memory_space<vmem>>, vector<8x1xf32>
    %8 = vector.broadcast %7 : vector<8x1xf32> to vector<8x326xf32>
    %9 = arith.addf %6, %8 : vector<8x326xf32>
    %cst = arith.constant 0.000000e+00 : f32
    %10 = vector.broadcast %cst : f32 to vector<8x326xf32>
    %11 = arith.maximumf %9, %10 : vector<8x326xf32>
    %12 = arith.truncf %11 : vector<8x326xf32> to vector<8x326xbf16>
    %13 = vector.extract_strided_slice %12 {offsets = [0, 0], sizes = [8, 288], strides = [1, 1]} : vector<8x326xbf16> to vector<8x288xbf16>
    %14 = vector.extract_strided_slice %12 {offsets = [0, 1], sizes = [8, 288], strides = [1, 1]} : vector<8x326xbf16> to vector<8x288xbf16>
    %15 = vector.extract_strided_slice %12 {offsets = [0, 2], sizes = [8, 288], strides = [1, 1]} : vector<8x326xbf16> to vector<8x288xbf16>
    %16 = vector.extract_strided_slice %12 {offsets = [0, 18], sizes = [8, 288], strides = [1, 1]} : vector<8x326xbf16> to vector<8x288xbf16>
    %17 = vector.extract_strided_slice %12 {offsets = [0, 19], sizes = [8, 288], strides = [1, 1]} : vector<8x326xbf16> to vector<8x288xbf16>
    %18 = vector.extract_strided_slice %12 {offsets = [0, 20], sizes = [8, 288], strides = [1, 1]} : vector<8x326xbf16> to vector<8x288xbf16>
    %19 = vector.extract_strided_slice %12 {offsets = [0, 36], sizes = [8, 288], strides = [1, 1]} : vector<8x326xbf16> to vector<8x288xbf16>
    %20 = vector.extract_strided_slice %12 {offsets = [0, 37], sizes = [8, 288], strides = [1, 1]} : vector<8x326xbf16> to vector<8x288xbf16>
    %21 = vector.extract_strided_slice %12 {offsets = [0, 38], sizes = [8, 288], strides = [1, 1]} : vector<8x326xbf16> to vector<8x288xbf16>
    %22 = tpu.concatenate %13, %14, %15, %16, %17, %18, %19, %20, %21 in 0 : vector<8x288xbf16>, vector<8x288xbf16>, vector<8x288xbf16>, vector<8x288xbf16>, vector<8x288xbf16>, vector<8x288xbf16>, vector<8x288xbf16>, vector<8x288xbf16>, vector<8x288xbf16> -> vector<72x288xbf16>
    %cst_10 = arith.constant dense<0.000000e+00> : vector<8x288xf32>
    %23 = tpu.matmul %0, %22, %cst_10 {dimension_numbers = #tpu.dot_dimension_numbers<[1], [0], [0], [1], [0, 0, 1, 1], [], []>} : vector<8x72xbf16>, vector<72x288xbf16>, vector<8x288xf32> -> vector<8x288xf32>
    %c0_11 = arith.constant 0 : index
    %c0_12 = arith.constant 0 : index
    %c0_13 = arith.constant 0 : index
    %24 = vector.load %arg6[%c0_11, %c0_12, %c0_13] : memref<2x8x288xf32, #tpu.memory_space<vmem>>, vector<1x8x288xf32>
    %25 = vector.shape_cast %24 : vector<1x8x288xf32> to vector<8x288xf32>
    %26 = vector.shape_cast %23 : vector<8x288xf32> to vector<1x8x288xf32>
    tpu.vector_store %arg6[%c0_11, %c0_12, %c0_13], %26 {strides = array<i32>} : memref<2x8x288xf32, #tpu.memory_space<vmem>>, vector<1x8x288xf32>,
    %27 = vector.broadcast %1 : vector<1x288xf32> to vector<8x288xf32>
    %28 = arith.mulf %23, %27 : vector<8x288xf32>
    %cst_14 = arith.constant dense<0.000000e+00> : vector<8xf32>
    %29 = vector.multi_reduction <add>, %28, %cst_14 [1] : vector<8x288xf32> to vector<8xf32>
    %30 = vector.shape_cast %29 : vector<8xf32> to vector<8x1xf32>
    %31 = arith.mulf %28, %23 : vector<8x288xf32>
    %cst_15 = arith.constant dense<0.000000e+00> : vector<8xf32>
    %32 = vector.multi_reduction <add>, %31, %cst_15 [1] : vector<8x288xf32> to vector<8xf32>
    %33 = vector.shape_cast %32 : vector<8xf32> to vector<8x1xf32>
    %c1 = arith.constant 1 : index
    %c0_16 = arith.constant 0 : index
    %c0_17 = arith.constant 0 : index
    %34 = vector.load %arg1[%c1, %c0_16, %c0_17] : memref<2x8x326xf32, #tpu.memory_space<vmem>>, vector<1x8x326xf32>
    %35 = vector.shape_cast %34 : vector<1x8x326xf32> to vector<8x326xf32>
    %c0_18 = arith.constant 0 : index
    %c0_19 = arith.constant 0 : index
    %36 = vector.load %arg4[%c0_18, %c0_19] : memref<8x1xf32, #tpu.memory_space<vmem>>, vector<8x1xf32>
    %37 = vector.broadcast %36 : vector<8x1xf32> to vector<8x326xf32>
    %38 = arith.mulf %35, %37 : vector<8x326xf32>
    %c0_20 = arith.constant 0 : index
    %c0_21 = arith.constant 0 : index
    %39 = vector.load %arg5[%c0_20, %c0_21] : memref<8x1xf32, #tpu.memory_space<vmem>>, vector<8x1xf32>
    %40 = vector.broadcast %39 : vector<8x1xf32> to vector<8x326xf32>
    %41 = arith.addf %38, %40 : vector<8x326xf32>
    %cst_22 = arith.constant 0.000000e+00 : f32
    %42 = vector.broadcast %cst_22 : f32 to vector<8x326xf32>
    %43 = arith.maximumf %41, %42 : vector<8x326xf32>
    %44 = arith.truncf %43 : vector<8x326xf32> to vector<8x326xbf16>
    %45 = vector.extract_strided_slice %44 {offsets = [0, 0], sizes = [8, 288], strides = [1, 1]} : vector<8x326xbf16> to vector<8x288xbf16>
    %46 = vector.extract_strided_slice %44 {offsets = [0, 1], sizes = [8, 288], strides = [1, 1]} : vector<8x326xbf16> to vector<8x288xbf16>
    %47 = vector.extract_strided_slice %44 {offsets = [0, 2], sizes = [8, 288], strides = [1, 1]} : vector<8x326xbf16> to vector<8x288xbf16>
    %48 = vector.extract_strided_slice %44 {offsets = [0, 18], sizes = [8, 288], strides = [1, 1]} : vector<8x326xbf16> to vector<8x288xbf16>
    %49 = vector.extract_strided_slice %44 {offsets = [0, 19], sizes = [8, 288], strides = [1, 1]} : vector<8x326xbf16> to vector<8x288xbf16>
    %50 = vector.extract_strided_slice %44 {offsets = [0, 20], sizes = [8, 288], strides = [1, 1]} : vector<8x326xbf16> to vector<8x288xbf16>
    %51 = vector.extract_strided_slice %44 {offsets = [0, 36], sizes = [8, 288], strides = [1, 1]} : vector<8x326xbf16> to vector<8x288xbf16>
    %52 = vector.extract_strided_slice %44 {offsets = [0, 37], sizes = [8, 288], strides = [1, 1]} : vector<8x326xbf16> to vector<8x288xbf16>
    %53 = vector.extract_strided_slice %44 {offsets = [0, 38], sizes = [8, 288], strides = [1, 1]} : vector<8x326xbf16> to vector<8x288xbf16>
    %54 = tpu.concatenate %45, %46, %47, %48, %49, %50, %51, %52, %53 in 0 : vector<8x288xbf16>, vector<8x288xbf16>, vector<8x288xbf16>, vector<8x288xbf16>, vector<8x288xbf16>, vector<8x288xbf16>, vector<8x288xbf16>, vector<8x288xbf16>, vector<8x288xbf16> -> vector<72x288xbf16>
    %cst_23 = arith.constant dense<0.000000e+00> : vector<8x288xf32>
    %55 = tpu.matmul %0, %54, %cst_23 {dimension_numbers = #tpu.dot_dimension_numbers<[1], [0], [0], [1], [0, 0, 1, 1], [], []>} : vector<8x72xbf16>, vector<72x288xbf16>, vector<8x288xf32> -> vector<8x288xf32>
    %c1_24 = arith.constant 1 : index
    %c0_25 = arith.constant 0 : index
    %c0_26 = arith.constant 0 : index
    %56 = vector.load %arg6[%c1_24, %c0_25, %c0_26] : memref<2x8x288xf32, #tpu.memory_space<vmem>>, vector<1x8x288xf32>
    %57 = vector.shape_cast %56 : vector<1x8x288xf32> to vector<8x288xf32>
    %58 = vector.shape_cast %55 : vector<8x288xf32> to vector<1x8x288xf32>
    tpu.vector_store %arg6[%c1_24, %c0_25, %c0_26], %58 {strides = array<i32>} : memref<2x8x288xf32, #tpu.memory_space<vmem>>, vector<1x8x288xf32>,
    %59 = vector.broadcast %1 : vector<1x288xf32> to vector<8x288xf32>
    %60 = arith.mulf %55, %59 : vector<8x288xf32>
    %cst_27 = arith.constant dense<0.000000e+00> : vector<8xf32>
    %61 = vector.multi_reduction <add>, %60, %cst_27 [1] : vector<8x288xf32> to vector<8xf32>
    %62 = vector.shape_cast %61 : vector<8xf32> to vector<8x1xf32>
    %63 = arith.mulf %60, %55 : vector<8x288xf32>
    %cst_28 = arith.constant dense<0.000000e+00> : vector<8xf32>
    %64 = vector.multi_reduction <add>, %63, %cst_28 [1] : vector<8x288xf32> to vector<8xf32>
    %65 = vector.shape_cast %64 : vector<8xf32> to vector<8x1xf32>
    %66 = arith.addf %30, %62 : vector<8x1xf32>
    %67 = arith.addf %33, %65 : vector<8x1xf32>
    %68 = tpu.concatenate %66, %67 in 1 : vector<8x1xf32>, vector<8x1xf32> -> vector<8x2xf32>
    %c0_29 = arith.constant 0 : index
    %c0_30 = arith.constant 0 : index
    %c0_31 = arith.constant 0 : index
    %69 = vector.load %arg7[%c0_29, %c0_30, %c0_31] : memref<1x8x2xf32, #tpu.memory_space<vmem>>, vector<1x8x2xf32>
    %70 = vector.shape_cast %69 : vector<1x8x2xf32> to vector<8x2xf32>
    %71 = vector.shape_cast %68 : vector<8x2xf32> to vector<1x8x2xf32>
    tpu.vector_store %arg7[%c0_29, %c0_30, %c0_31], %71 {strides = array<i32>} : memref<1x8x2xf32, #tpu.memory_space<vmem>>, vector<1x8x2xf32>,
    return
  }
  func.func @transform_0(%arg0: i32) -> (i32, i32, i32) {
    %c0_i32 = arith.constant 0 : i32
    %c0_i32_0 = arith.constant 0 : i32
    %c0_i32_1 = arith.constant 0 : i32
    return %arg0, %c0_i32, %c0_i32_0 : i32, i32, i32
  }
  func.func @transform_1(%arg0: i32) -> (i32, i32) {
    %c0_i32 = arith.constant 0 : i32
    %c0_i32_0 = arith.constant 0 : i32
    %c0_i32_1 = arith.constant 0 : i32
    return %c0_i32, %c0_i32_0 : i32, i32
  }
  func.func @transform_2(%arg0: i32) -> (i32, i32) {
    %c0_i32 = arith.constant 0 : i32
    %c0_i32_0 = arith.constant 0 : i32
    %c0_i32_1 = arith.constant 0 : i32
    return %c0_i32, %c0_i32_0 : i32, i32
  }
  func.func @transform_3(%arg0: i32) -> (i32, i32) {
    %c0_i32 = arith.constant 0 : i32
    %c0_i32_0 = arith.constant 0 : i32
    %c0_i32_1 = arith.constant 0 : i32
    return %c0_i32, %c0_i32_0 : i32, i32
  }
  func.func @transform_4(%arg0: i32) -> (i32, i32) {
    %c0_i32 = arith.constant 0 : i32
    %c0_i32_0 = arith.constant 0 : i32
    %c0_i32_1 = arith.constant 0 : i32
    return %c0_i32, %c0_i32_0 : i32, i32
  }
  func.func @transform_5(%arg0: i32) -> (i32, i32, i32) {
    %c0_i32 = arith.constant 0 : i32
    %c0_i32_0 = arith.constant 0 : i32
    %c0_i32_1 = arith.constant 0 : i32
    return %arg0, %c0_i32, %c0_i32_0 : i32, i32, i32
  }
  func.func @transform_6(%arg0: i32) -> (i32, i32, i32) {
    %c0_i32 = arith.constant 0 : i32
    %c0_i32_0 = arith.constant 0 : i32
    %c0_i32_1 = arith.constant 0 : i32
    return %arg0, %c0_i32, %c0_i32_0 : i32, i32, i32
  }
}

module attributes {stable_mosaic.version = 11 : i64} {
  func.func @kernel(%arg0: i32, %arg1: memref<2x64x36xf32, #tpu.memory_space<vmem>>, %arg2: memref<64x1xf32, #tpu.memory_space<vmem>>, %arg3: memref<64x1xf32, #tpu.memory_space<vmem>>, %arg4: memref<4x36x8xf32, #tpu.memory_space<vmem>>, %arg5: memref<2x64x8xf32, #tpu.memory_space<vmem>>) attributes {dimension_semantics = [#tpu.dimension_semantics<parallel>], iteration_bounds = array<i64: 2>, scalar_prefetch = 0 : i64, scratch_operands = 0 : i64, tpu.core_type = #tpu.core_type<tc>, window_params = [{transform_indices = @transform_0, window_bounds = array<i64: 2, 64, 36>}, {pipeline_mode = #tpu.pipeline_mode<synchronous>, transform_indices = @transform_1, window_bounds = array<i64: 64, 1>}, {pipeline_mode = #tpu.pipeline_mode<synchronous>, transform_indices = @transform_2, window_bounds = array<i64: 64, 1>}, {pipeline_mode = #tpu.pipeline_mode<synchronous>, transform_indices = @transform_3, window_bounds = array<i64: 4, 36, 8>}, {transform_indices = @transform_4, window_bounds = array<i64: 2, 64, 8>}]} {
    %c0 = arith.constant 0 : index
    %c0_0 = arith.constant 0 : index
    %0 = vector.load %arg2[%c0, %c0_0] : memref<64x1xf32, #tpu.memory_space<vmem>>, vector<64x1xf32>
    %c0_1 = arith.constant 0 : index
    %c0_2 = arith.constant 0 : index
    %1 = vector.load %arg3[%c0_1, %c0_2] : memref<64x1xf32, #tpu.memory_space<vmem>>, vector<64x1xf32>
    %c0_3 = arith.constant 0 : index
    %c0_4 = arith.constant 0 : index
    %c0_5 = arith.constant 0 : index
    %2 = vector.load %arg1[%c0_3, %c0_4, %c0_5] : memref<2x64x36xf32, #tpu.memory_space<vmem>>, vector<1x64x36xf32>
    %3 = vector.shape_cast %2 : vector<1x64x36xf32> to vector<64x36xf32>
    %4 = vector.broadcast %0 : vector<64x1xf32> to vector<64x36xf32>
    %5 = arith.mulf %3, %4 : vector<64x36xf32>
    %6 = vector.broadcast %1 : vector<64x1xf32> to vector<64x36xf32>
    %7 = arith.addf %5, %6 : vector<64x36xf32>
    %cst = arith.constant 0.000000e+00 : f32
    %8 = vector.broadcast %cst : f32 to vector<64x36xf32>
    %9 = arith.maximumf %7, %8 : vector<64x36xf32>
    %c0_6 = arith.constant 0 : index
    %c0_7 = arith.constant 0 : index
    %c0_8 = arith.constant 0 : index
    %10 = vector.load %arg4[%c0_6, %c0_7, %c0_8] : memref<4x36x8xf32, #tpu.memory_space<vmem>>, vector<1x36x8xf32>
    %11 = vector.shape_cast %10 : vector<1x36x8xf32> to vector<36x8xf32>
    %cst_9 = arith.constant dense<0.000000e+00> : vector<64x8xf32>
    %12 = tpu.matmul %9, %11, %cst_9 {dimension_numbers = #tpu.dot_dimension_numbers<[1], [0], [0], [1], [0, 0, 1, 1], [], []>} : vector<64x36xf32>, vector<36x8xf32>, vector<64x8xf32> -> vector<64x8xf32>
    %c1 = arith.constant 1 : index
    %c0_10 = arith.constant 0 : index
    %c0_11 = arith.constant 0 : index
    %13 = vector.load %arg4[%c1, %c0_10, %c0_11] : memref<4x36x8xf32, #tpu.memory_space<vmem>>, vector<1x36x8xf32>
    %14 = vector.shape_cast %13 : vector<1x36x8xf32> to vector<36x8xf32>
    %cst_12 = arith.constant dense<0.000000e+00> : vector<64x8xf32>
    %15 = tpu.matmul %9, %14, %cst_12 {dimension_numbers = #tpu.dot_dimension_numbers<[1], [0], [0], [1], [0, 0, 1, 1], [], []>} : vector<64x36xf32>, vector<36x8xf32>, vector<64x8xf32> -> vector<64x8xf32>
    %c2 = arith.constant 2 : index
    %c0_13 = arith.constant 0 : index
    %c0_14 = arith.constant 0 : index
    %16 = vector.load %arg4[%c2, %c0_13, %c0_14] : memref<4x36x8xf32, #tpu.memory_space<vmem>>, vector<1x36x8xf32>
    %17 = vector.shape_cast %16 : vector<1x36x8xf32> to vector<36x8xf32>
    %cst_15 = arith.constant dense<0.000000e+00> : vector<64x8xf32>
    %18 = tpu.matmul %9, %17, %cst_15 {dimension_numbers = #tpu.dot_dimension_numbers<[1], [0], [0], [1], [0, 0, 1, 1], [], []>} : vector<64x36xf32>, vector<36x8xf32>, vector<64x8xf32> -> vector<64x8xf32>
    %c3 = arith.constant 3 : index
    %c0_16 = arith.constant 0 : index
    %c0_17 = arith.constant 0 : index
    %19 = vector.load %arg4[%c3, %c0_16, %c0_17] : memref<4x36x8xf32, #tpu.memory_space<vmem>>, vector<1x36x8xf32>
    %20 = vector.shape_cast %19 : vector<1x36x8xf32> to vector<36x8xf32>
    %cst_18 = arith.constant dense<0.000000e+00> : vector<64x8xf32>
    %21 = tpu.matmul %9, %20, %cst_18 {dimension_numbers = #tpu.dot_dimension_numbers<[1], [0], [0], [1], [0, 0, 1, 1], [], []>} : vector<64x36xf32>, vector<36x8xf32>, vector<64x8xf32> -> vector<64x8xf32>
    %22 = arith.maximumf %12, %15 : vector<64x8xf32>
    %23 = arith.maximumf %18, %21 : vector<64x8xf32>
    %24 = arith.maximumf %22, %23 : vector<64x8xf32>
    %c0_19 = arith.constant 0 : index
    %c0_20 = arith.constant 0 : index
    %c0_21 = arith.constant 0 : index
    %25 = vector.load %arg5[%c0_19, %c0_20, %c0_21] : memref<2x64x8xf32, #tpu.memory_space<vmem>>, vector<1x64x8xf32>
    %26 = vector.shape_cast %25 : vector<1x64x8xf32> to vector<64x8xf32>
    %27 = vector.shape_cast %24 : vector<64x8xf32> to vector<1x64x8xf32>
    tpu.vector_store %arg5[%c0_19, %c0_20, %c0_21], %27 {strides = array<i32>} : memref<2x64x8xf32, #tpu.memory_space<vmem>>, vector<1x64x8xf32>,
    %c1_22 = arith.constant 1 : index
    %c0_23 = arith.constant 0 : index
    %c0_24 = arith.constant 0 : index
    %28 = vector.load %arg1[%c1_22, %c0_23, %c0_24] : memref<2x64x36xf32, #tpu.memory_space<vmem>>, vector<1x64x36xf32>
    %29 = vector.shape_cast %28 : vector<1x64x36xf32> to vector<64x36xf32>
    %30 = vector.broadcast %0 : vector<64x1xf32> to vector<64x36xf32>
    %31 = arith.mulf %29, %30 : vector<64x36xf32>
    %32 = vector.broadcast %1 : vector<64x1xf32> to vector<64x36xf32>
    %33 = arith.addf %31, %32 : vector<64x36xf32>
    %cst_25 = arith.constant 0.000000e+00 : f32
    %34 = vector.broadcast %cst_25 : f32 to vector<64x36xf32>
    %35 = arith.maximumf %33, %34 : vector<64x36xf32>
    %c0_26 = arith.constant 0 : index
    %c0_27 = arith.constant 0 : index
    %c0_28 = arith.constant 0 : index
    %36 = vector.load %arg4[%c0_26, %c0_27, %c0_28] : memref<4x36x8xf32, #tpu.memory_space<vmem>>, vector<1x36x8xf32>
    %37 = vector.shape_cast %36 : vector<1x36x8xf32> to vector<36x8xf32>
    %cst_29 = arith.constant dense<0.000000e+00> : vector<64x8xf32>
    %38 = tpu.matmul %35, %37, %cst_29 {dimension_numbers = #tpu.dot_dimension_numbers<[1], [0], [0], [1], [0, 0, 1, 1], [], []>} : vector<64x36xf32>, vector<36x8xf32>, vector<64x8xf32> -> vector<64x8xf32>
    %c1_30 = arith.constant 1 : index
    %c0_31 = arith.constant 0 : index
    %c0_32 = arith.constant 0 : index
    %39 = vector.load %arg4[%c1_30, %c0_31, %c0_32] : memref<4x36x8xf32, #tpu.memory_space<vmem>>, vector<1x36x8xf32>
    %40 = vector.shape_cast %39 : vector<1x36x8xf32> to vector<36x8xf32>
    %cst_33 = arith.constant dense<0.000000e+00> : vector<64x8xf32>
    %41 = tpu.matmul %35, %40, %cst_33 {dimension_numbers = #tpu.dot_dimension_numbers<[1], [0], [0], [1], [0, 0, 1, 1], [], []>} : vector<64x36xf32>, vector<36x8xf32>, vector<64x8xf32> -> vector<64x8xf32>
    %c2_34 = arith.constant 2 : index
    %c0_35 = arith.constant 0 : index
    %c0_36 = arith.constant 0 : index
    %42 = vector.load %arg4[%c2_34, %c0_35, %c0_36] : memref<4x36x8xf32, #tpu.memory_space<vmem>>, vector<1x36x8xf32>
    %43 = vector.shape_cast %42 : vector<1x36x8xf32> to vector<36x8xf32>
    %cst_37 = arith.constant dense<0.000000e+00> : vector<64x8xf32>
    %44 = tpu.matmul %35, %43, %cst_37 {dimension_numbers = #tpu.dot_dimension_numbers<[1], [0], [0], [1], [0, 0, 1, 1], [], []>} : vector<64x36xf32>, vector<36x8xf32>, vector<64x8xf32> -> vector<64x8xf32>
    %c3_38 = arith.constant 3 : index
    %c0_39 = arith.constant 0 : index
    %c0_40 = arith.constant 0 : index
    %45 = vector.load %arg4[%c3_38, %c0_39, %c0_40] : memref<4x36x8xf32, #tpu.memory_space<vmem>>, vector<1x36x8xf32>
    %46 = vector.shape_cast %45 : vector<1x36x8xf32> to vector<36x8xf32>
    %cst_41 = arith.constant dense<0.000000e+00> : vector<64x8xf32>
    %47 = tpu.matmul %35, %46, %cst_41 {dimension_numbers = #tpu.dot_dimension_numbers<[1], [0], [0], [1], [0, 0, 1, 1], [], []>} : vector<64x36xf32>, vector<36x8xf32>, vector<64x8xf32> -> vector<64x8xf32>
    %48 = arith.maximumf %38, %41 : vector<64x8xf32>
    %49 = arith.maximumf %44, %47 : vector<64x8xf32>
    %50 = arith.maximumf %48, %49 : vector<64x8xf32>
    %c1_42 = arith.constant 1 : index
    %c0_43 = arith.constant 0 : index
    %c0_44 = arith.constant 0 : index
    %51 = vector.load %arg5[%c1_42, %c0_43, %c0_44] : memref<2x64x8xf32, #tpu.memory_space<vmem>>, vector<1x64x8xf32>
    %52 = vector.shape_cast %51 : vector<1x64x8xf32> to vector<64x8xf32>
    %53 = vector.shape_cast %50 : vector<64x8xf32> to vector<1x64x8xf32>
    tpu.vector_store %arg5[%c1_42, %c0_43, %c0_44], %53 {strides = array<i32>} : memref<2x64x8xf32, #tpu.memory_space<vmem>>, vector<1x64x8xf32>,
    return
  }
  func.func @transform_0(%arg0: i32) -> (i32, i32, i32) {
    %c0_i32 = arith.constant 0 : i32
    %c0_i32_0 = arith.constant 0 : i32
    %c0_i32_1 = arith.constant 0 : i32
    return %arg0, %c0_i32, %c0_i32_0 : i32, i32, i32
  }
  func.func @transform_1(%arg0: i32) -> (i32, i32) {
    %c0_i32 = arith.constant 0 : i32
    %c0_i32_0 = arith.constant 0 : i32
    %c0_i32_1 = arith.constant 0 : i32
    return %c0_i32, %c0_i32_0 : i32, i32
  }
  func.func @transform_2(%arg0: i32) -> (i32, i32) {
    %c0_i32 = arith.constant 0 : i32
    %c0_i32_0 = arith.constant 0 : i32
    %c0_i32_1 = arith.constant 0 : i32
    return %c0_i32, %c0_i32_0 : i32, i32
  }
  func.func @transform_3(%arg0: i32) -> (i32, i32, i32) {
    %c0_i32 = arith.constant 0 : i32
    %c0_i32_0 = arith.constant 0 : i32
    %c0_i32_1 = arith.constant 0 : i32
    %c0_i32_2 = arith.constant 0 : i32
    return %c0_i32, %c0_i32_0, %c0_i32_1 : i32, i32, i32
  }
  func.func @transform_4(%arg0: i32) -> (i32, i32, i32) {
    %c0_i32 = arith.constant 0 : i32
    %c0_i32_0 = arith.constant 0 : i32
    %c0_i32_1 = arith.constant 0 : i32
    return %arg0, %c0_i32, %c0_i32_0 : i32, i32, i32
  }
}

</mosaic_0001>

<bundles_post_ra>
// kernel: cnn_block_forward.3
= control target key start
LH: loop header
LB: loop body
LE: loop exit
PB: predicated region body
PF: predicated region fallthrough
CT: control target
= control target key end

     0   :  { %s798_s15 = smov 0   ;;  %s1037_s0 = inlined_call_operand.vmem [shape: bf16[4,8,326], index: 0, kind: input, shape index: {}]   ;;  %s1038_s1 = inlined_call_operand.vmem [shape: bf16[8,72], index: 1, kind: input, shape index: {}]   ;;  %s1039_s2 = inlined_call_operand.vmem [shape: f32[1,288], index: 2, kind: input, shape index: {}]   ;;  %s1040_s3 = inlined_call_operand.vmem [shape: f32[4,8,288], index: 3, kind: output, shape index: {0}]   ;;  %s1041_s4 = inlined_call_operand.vmem [shape: f32[2,8,2], index: 4, kind: output, shape index: {1}]  }
   0x1 LB: > { %s804_s16 = sadd.s32 4294967295, %s763_s15   ;;  %p720_p0 = scmp.ge.s32.totalorder %s763_s15, 1  ;;  %s763_s15 = sphi %s798_s15, %s15_s15  }
   0x2   : > { %p167_p1 = scmp.lt.s32.totalorder %s763_s15, 3 }
   0x4   : > { %p168_p2 = pnand %p720_p0, %p167_p1 }
   0x5   : > { %s721_s17 = sshll.u32 (!%p168_p2), %s804_s16, 1  ;;  %s765_s22 = smov (!%p168_p2), 90  }
   0x6   : > { %171 = sbr.rel (%p168_p2) target bundleno = 525 (0x20d), region = 32  ;;  %p200_p3 = scmp.lt.s32.totalorder (!%p168_p2), %s721_s17, 3 }
   0x7   : > { %s766_s23 = smov (!%p168_p2), 92   ;;  %s767_s24 = smov (!%p168_p2), 91  }
   0x8   : > { %s768_s25 = smov (!%p168_p2), 108   ;;  %s769_s26 = smov (!%p168_p2), 109  }
   0x9   : > { %s770_s27 = smov (!%p168_p2), 126   ;;  %s771_s28 = smov (!%p168_p2), 110  }
   0xa   : > { %s772_s29 = smov (!%p168_p2), 127   ;;  %p213_p4 = scmp.lt.s32.totalorder (!%p168_p2), %s804_s16, 1 }
   0xb   : > { %s1043_s17 = smov (!%p200_p3, %s721_s17), 3  ;;  %vm302_vm0 = vcmask 1043456   ;;  %vm299_vm1 = vcmask 736256   ;;  %vm281_vm2 = vcmask 752640   ;;  %vm290_vm3 = vcmask 744448  }
   0xc   : > { %s739_s18 = smul.u32 12, %s1043_s17  ;;  %vm263_vm4 = vcmask 891904   ;;  %vm272_vm5 = vcmask 883712   ;;  %vm254_vm6 = vcmask 900096   ;;  %vm245_vm7 = vcmask 1031168   ;;  %s1045_s16 = smov (!%p213_p4, %s804_s16), 1 }
   0xd   : > { %vm236_vm8 = vcmask 1039360   ;;  %vm351_vm9 = vcmask 588800   ;;  %s740_s6 = smul.u32 24, %s1043_s17  ;;  %vm405_vm10 = vcmask 261120   ;;  %s725_s12 = sshll.u32 %s1045_s16, 3  ;;  %vm623_vm11 = vcmask 7168  }
   0xe   : > { %s815_s21 = scalar_lea.vmem %s1037_s0, %s739_s18  ;;  %s216_s17 = scalar_lea.vmem %s1041_s4, %s725_s12  ;;  %vm625_vm12 = vcmask 15360  }
   0xf   : > { %v221_v0 = vld [vmem:[%s815_s21 + $0x8] sm:$0xf]  ;;  %v220_v1 = vld [vmem:[%s815_s21] sm:$0xff]  ;;  %v729_v8 = vld [vmem:[%s815_s21 + $0xc] sm:$0xff]  ;;  %s1012_s9 = scalar_lea.vmem %s1040_s3, %s740_s6 }
  0x10   : > { %v226_v2 = vunpack.c.l.b16 %v221_v0  ;;  %v225_v3 = vunpack.c.h.b16 %v220_v1  ;;  %v224_v4 = vunpack.c.l.b16 %v220_v1  ;;  %v436_v9 = vunpack.c.h.b16 %v729_v8  ;;  %v730_v13 = vld [vmem:[%s815_s21 + $0x14] sm:$0xf] }
  0x11   : > { %v435_v10 = vunpack.c.l.b16 %v729_v8  ;;  %v437_v14 = vunpack.c.l.b16 %v730_v13 }
  0x12   : > { %v819_v5 = vpack.c.b16 %v226_v2, %v226_v2  ;;  %v821_v6 = vpack.c.b16 %v225_v3, %v225_v3  ;;  %v823_v7 = vpack.c.b16 %v224_v4, %v224_v4  ;;  %v856_v11 = vpack.c.b16 %v436_v9, %v436_v9 }
  0x13   : > { %v858_v12 = vpack.c.b16 %v435_v10, %v435_v10  ;;  %v885_v15 = vpack.c.b16 %v437_v14, %v437_v14 }
  0x14   : > { %297 = vrot.lane.b32.xlu1 %v819_v5, %s765_s22  ;;  %277 = vrot.lane.b32.xlu2 %v821_v6, %s766_s23 }
  0x15   : > { %293 = vrot.lane.b32.xlu0 %v823_v7, %s765_s22 }
  0x1c   : > { %284 = vrot.lane.b32.xlu2 %v823_v7, %s767_s24  ;;  %275 = vrot.lane.b32.xlu1 %v823_v7, %s766_s23 }
  0x1d   : > { %295 = vrot.lane.b32.xlu0 %v821_v6, %s765_s22 }
  0x24   : > { %288 = vrot.lane.b32.xlu2 %v819_v5, %s767_s24  ;;  %279 = vrot.lane.b32.xlu1 %v819_v5, %s766_s23 }
  0x25   : > { %286 = vrot.lane.b32.xlu0 %v821_v6, %s767_s24 }
  0x2c   : > { %266 = vrot.lane.b32.xlu2 %v823_v7, %s768_s25  ;;  %259 = vrot.lane.b32.xlu1 %v821_v6, %s769_s26 }
  0x2d   : > { %257 = vrot.lane.b32.xlu0 %v823_v7, %s769_s26 }
  0x34   : > { %270 = vrot.lane.b32.xlu2 %v819_v5, %s768_s25  ;;  %261 = vrot.lane.b32.xlu1 %v819_v5, %s769_s26 }
  0x35   : > { %268 = vrot.lane.b32.xlu0 %v821_v6, %s768_s25 }
  0x3c   : > { %239 = vrot.lane.b32.xlu2 %v823_v7, %s770_s27  ;;  %499 = vrot.lane.b32.xlu1 %v856_v11, %s765_s22 }
  0x3d   : > { %497 = vrot.lane.b32.xlu0 %v858_v12, %s765_s22 }
  0x44   : > { %250 = vrot.lane.b32.xlu2 %v821_v6, %s771_s28  ;;  %248 = vrot.lane.b32.xlu1 %v823_v7, %s771_s28 }
  0x45   : > { %241 = vrot.lane.b32.xlu0 %v821_v6, %s770_s27 }
  0x4c   : > { %481 = vrot.lane.b32.xlu2 %v858_v12, %s766_s23  ;;  %252 = vrot.lane.b32.xlu1 %v819_v5, %s771_s28 }
  0x4d   : > { %243 = vrot.lane.b32.xlu0 %v819_v5, %s770_s27 }
  0x54   : > { %491 = vrot.lane.b32.xlu2 %v856_v11, %s767_s24  ;;  %489 = vrot.lane.b32.xlu1 %v858_v12, %s767_s24 }
  0x55   : > { %483 = vrot.lane.b32.xlu0 %v856_v11, %s766_s23 }
  0x5c   : > { %501 = vrot.lane.b32.xlu2 %v885_v15, %s765_s22  ;;  %232 = vrot.lane.b32.xlu1 %v821_v6, %s772_s29 }
  0x5d   : > { %230 = vrot.lane.b32.xlu0 %v823_v7, %s772_s29 }
  0x64   : > { %467 = vrot.lane.b32.xlu2 %v856_v11, %s769_s26  ;;  %465 = vrot.lane.b32.xlu1 %v858_v12, %s769_s26 }
  0x65   : > { %234 = vrot.lane.b32.xlu0 %v819_v5, %s772_s29 }
  0x6c   : > { %485 = vrot.lane.b32.xlu2 %v885_v15, %s766_s23  ;;  %475 = vrot.lane.b32.xlu1 %v856_v11, %s768_s25 }
  0x6d   : > { %473 = vrot.lane.b32.xlu0 %v858_v12, %s768_s25 }
  0x6e   : > { %v278_v16 = vpop.permute.xlu2 %277 }
  0x74   : > { %449 = vrot.lane.b32.xlu1 %v858_v12, %s770_s27  ;;  %451 = vrot.lane.b32.xlu2 %v856_v11, %s770_s27 }
  0x75   : > { %493 = vrot.lane.b32.xlu0 %v885_v15, %s767_s24 }
  0x76   : > { %v285_v17 = vpop.permute.xlu2 %284 }
  0x7c   : > { %459 = vrot.lane.b32.xlu1 %v856_v11, %s771_s28  ;;  %469 = vrot.lane.b32.xlu2 %v885_v15, %s769_s26 }
  0x7d   : > { %457 = vrot.lane.b32.xlu0 %v858_v12, %s771_s28 }
  0x7e   : > { %v289_v18 = vpop.permute.xlu2 %288 }
  0x84   : > { %441 = vrot.lane.b32.xlu1 %v858_v12, %s772_s29  ;;  %443 = vrot.lane.b32.xlu2 %v856_v11, %s772_s29 }
  0x85   : > { %477 = vrot.lane.b32.xlu0 %v885_v15, %s768_s25 }
  0x86   : > { %v298_v19 = vpop.permute.xlu1 %297  ;;  %v267_v22 = vpop.permute.xlu2 %266 }
  0x87   : > { %v294_v20 = vpop.permute.xlu0 %293  ;;  %v362_v21 = vsel %vm302_vm0, %v298_v19, 0 }
  0x88   : > { %393 = vmatpush.bf16.msra.mxu2 %v362_v21 }
  0x8c   : > { %461 = vrot.lane.b32.xlu1 %v885_v15, %s771_s28  ;;  %445 = vrot.lane.b32.xlu2 %v885_v15, %s772_s29 }
  0x8d   : > { %453 = vrot.lane.b32.xlu0 %v885_v15, %s770_s27 }
  0x8e   : > { %v276_v23 = vpop.permute.xlu1 %275  ;;  %v271_v29 = vpop.permute.xlu2 %270 }
  0x8f   : > { %v296_v24 = vpop.permute.xlu0 %295  ;;  %v282_v34 = vsel %vm281_vm2, %v276_v23, %v278_v16 }
  0x90   : > { %v300_v25 = vsel %vm299_vm1, %v294_v20, %v296_v24  ;;  %v301_v26 = vsel %vm299_vm1, %v296_v24, %v298_v19  ;;  %v962_v24 = vld [vmem:[%s1038_s1] sm:$0xf] }
  0x91   : > { %v356_v27 = vsel %vm302_vm0, %v300_v25, 0  ;;  %v359_v28 = vsel %vm302_vm0, %v301_v26, 0 }
  0x92   : > { %367 = vmatpush.bf16.msra.mxu0 %v356_v27  ;;  %380 = vmatpush.bf16.msra.mxu1 %v359_v28 }
  0x96   : > { %v280_v30 = vpop.permute.xlu1 %279  ;;  %v240_v40 = vpop.permute.xlu2 %239 }
  0x97   : > { %v283_v31 = vsel %vm281_vm2, %v278_v16, %v280_v30  ;;  %v287_v32 = vpop.permute.xlu0 %286  ;;  %v349_v33 = vsel %vm302_vm0, %v280_v30, %v289_v18 }
  0x98   : > { %v291_v35 = vsel %vm290_vm3, %v285_v17, %v287_v32  ;;  %v292_v36 = vsel %vm290_vm3, %v287_v32, %v289_v18  ;;  %394 = vmatpush.bf16.msra.mxu2 %v349_v33 }
  0x99   : > { %v341_v37 = vsel %vm302_vm0, %v282_v34, %v291_v35  ;;  %v345_v38 = vsel %vm302_vm0, %v283_v31, %v292_v36 }
  0x9a   : > { %368 = vmatpush.bf16.msra.mxu0 %v341_v37  ;;  %381 = vmatpush.bf16.msra.mxu1 %v345_v38 }
  0x9e   : > { %v260_v39 = vpop.permute.xlu1 %259  ;;  %v251_v49 = vpop.permute.xlu2 %250 }
  0x9f   : > { %v258_v41 = vpop.permute.xlu0 %257 }
  0xa0   : > { %v264_v46 = vsel %vm263_vm4, %v258_v41, %v260_v39 }
  0xa6   : > { %v262_v42 = vpop.permute.xlu1 %261  ;;  %v482_v56 = vpop.permute.xlu2 %481 }
  0xa7   : > { %v265_v43 = vsel %vm263_vm4, %v260_v39, %v262_v42  ;;  %v269_v44 = vpop.permute.xlu0 %268  ;;  %v337_v45 = vsel %vm302_vm0, %v262_v42, %v271_v29 }
  0xa8   : > { %v273_v47 = vsel %vm272_vm5, %v267_v22, %v269_v44  ;;  %v274_v48 = vsel %vm272_vm5, %v269_v44, %v271_v29  ;;  %395 = vmatpush.bf16.msra.mxu2 %v337_v45 }
  0xa9   : > { %v329_v50 = vsel %vm302_vm0, %v264_v46, %v273_v47  ;;  %v333_v51 = vsel %vm302_vm0, %v265_v43, %v274_v48 }
  0xaa   : > { %369 = vmatpush.bf16.msra.mxu0 %v329_v50  ;;  %382 = vmatpush.bf16.msra.mxu1 %v333_v51 }
  0xae   : > { %v500_v52 = vpop.permute.xlu1 %499  ;;  %v492_v62 = vpop.permute.xlu2 %491 }
  0xaf   : > { %v498_v53 = vpop.permute.xlu0 %497 }
  0xb0   : > { %v503_v54 = vsel %vm299_vm1, %v498_v53, %v500_v52 }
  0xb1   : > { %v554_v55 = vsel %vm302_vm0, %v503_v54, 0 }
  0xb2   : > { %565 = vmatpush.bf16.msra.mxu3 %v554_v55 }
  0xb6   : > { %v249_v57 = vpop.permute.xlu1 %248  ;;  %v502_v9 = vpop.permute.xlu2 %501 }
  0xb7   : > { %v255_v58 = vsel %vm254_vm6, %v249_v57, %v251_v49  ;;  %v242_v59 = vpop.permute.xlu0 %241  ;;  %v504_v19 = vsel %vm299_vm1, %v500_v52, %v502_v9  ;;  %v560_v29 = vsel %vm302_vm0, %v502_v9, 0 }
  0xb8   : > { %v246_v60 = vsel %vm245_vm7, %v240_v40, %v242_v59  ;;  %v557_v23 = vsel %vm302_vm0, %v504_v19, 0 }
  0xb9   : > { %v317_v61 = vsel %vm302_vm0, %v246_v60, %v255_v58 }
  0xba   : > { %370 = vmatpush.bf16.msra.mxu0 %v317_v61 }
  0xbe   : > { %v253_v63 = vpop.permute.xlu1 %252  ;;  %v468_v21 = vpop.permute.xlu2 %467 }
  0xbf   : > { %v256_v0 = vsel %vm254_vm6, %v251_v49, %v253_v63  ;;  %v244_v1 = vpop.permute.xlu0 %243 }
  0xc0   : > { %v247_v2 = vsel %vm245_vm7, %v242_v59, %v244_v1  ;;  %v325_v3 = vsel %vm302_vm0, %v244_v1, %v253_v63 }
  0xc1   : > { %396 = vmatpush.bf16.msra.mxu2 %v325_v3  ;;  %v321_v4 = vsel %vm302_vm0, %v247_v2, %v256_v0 }
  0xc2   : > { %383 = vmatpush.bf16.msra.mxu1 %v321_v4 }
  0xc6   : > { %v490_v8 = vpop.permute.xlu1 %489  ;;  %v486_v30 = vpop.permute.xlu2 %485 }
  0xc7   : > { %v495_v10 = vsel %vm290_vm3, %v490_v8, %v492_v62  ;;  %v484_v13 = vpop.permute.xlu0 %483 }
  0xc8   : > { %v487_v14 = vsel %vm281_vm2, %v482_v56, %v484_v13  ;;  %v488_v37 = vsel %vm281_vm2, %v484_v13, %v486_v30 }
  0xc9   : > { %v543_v16 = vsel %vm302_vm0, %v487_v14, %v495_v10 }
  0xca   : > { %566 = vmatpush.bf16.msra.mxu3 %v543_v16 }
  0xce   : > { %v233_v17 = vpop.permute.xlu1 %232 }
  0xcf   : > { %v231_v18 = vpop.permute.xlu0 %230 }
  0xd0   : > { %v237_v20 = vsel %vm236_vm8, %v231_v18, %v233_v17 }
  0xd1   : > { %v305_v22 = vsel %vm302_vm0, %v823_v7, %v237_v20 }
  0xd2   : > { %371 = vmatpush.bf16.msra.mxu0 %v305_v22 }
  0xd5   : > { %726 = vmatmul.msk.bf16.vlgmr.msra.gmra.mxu0 %vm351_vm9, %v962_v24 }
  0xd6   : > { %578 = vmatpush.bf16.msrb.mxu0 %v557_v23  ;;  %v466_v25 = vpop.permute.xlu1 %465 }
  0xd7   : > { %v235_v26 = vpop.permute.xlu0 %234  ;;  %v471_v33 = vsel %vm263_vm4, %v466_v25, %v468_v21 }
  0xd8   : > { %v238_v27 = vsel %vm236_vm8, %v233_v17, %v235_v26  ;;  %v313_v7 = vsel %vm302_vm0, %v819_v5, %v235_v26 }
  0xd9   : > { %397 = vmatpush.bf16.msra.mxu2 %v313_v7  ;;  %v309_v28 = vsel %vm302_vm0, %v821_v6, %v238_v27  ;;  %v452_v6 = vpop.permute.xlu2 %451 }
  0xda   : > { %384 = vmatpush.bf16.msra.mxu1 %v309_v28 }
  0xdc   : > { %728 = vmatmul.msk.bf16.vlgmr.msra.gmra.mxu2 %vm351_vm9, %v962_v24 }
  0xdd   : > { %727 = vmatmul.msk.bf16.vlgmr.msra.gmra.mxu1 %vm351_vm9, %v962_v24 }
  0xde   : > { %591 = vmatpush.bf16.msrb.mxu1 %v560_v29  ;;  %v476_v31 = vpop.permute.xlu1 %475 }
  0xdf   : > { %v474_v32 = vpop.permute.xlu0 %473 }
  0xe0   : > { %v479_v5 = vsel %vm272_vm5, %v474_v32, %v476_v31 }
  0xe1   : > { %v531_v34 = vsel %vm302_vm0, %v471_v33, %v479_v5  ;;  %v470_v41 = vpop.permute.xlu2 %469 }
  0xe2   : > { %567 = vmatpush.bf16.msra.mxu3 %v531_v34  ;;  %v472_v51 = vsel %vm263_vm4, %v468_v21, %v470_v41 }
  0xe6   : > { %v450_v35 = vpop.permute.xlu1 %449 }
  0xe7   : > { %v494_v36 = vpop.permute.xlu0 %493  ;;  %v455_v44 = vsel %vm245_vm7, %v450_v35, %v452_v6 }
  0xe8   : > { %v496_v38 = vsel %vm290_vm3, %v492_v62, %v494_v36  ;;  %v551_v39 = vsel %vm302_vm0, %v486_v30, %v494_v36 }
  0xe9   : > { %592 = vmatpush.bf16.msrb.mxu1 %v551_v39  ;;  %v547_v40 = vsel %vm302_vm0, %v488_v37, %v496_v38  ;;  %v444_v47 = vpop.permute.xlu2 %443 }
  0xea   : > { %579 = vmatpush.bf16.msrb.mxu0 %v547_v40 }
  0xee   : > { %v460_v42 = vpop.permute.xlu1 %459 }
  0xef   : > { %v458_v43 = vpop.permute.xlu0 %457 }
  0xf0   : > { %v463_v45 = vsel %vm254_vm6, %v458_v43, %v460_v42 }
  0xf1   : > { %v519_v46 = vsel %vm302_vm0, %v455_v44, %v463_v45  ;;  %v446_v57 = vpop.permute.xlu2 %445 }
  0xf2   : > { %568 = vmatpush.bf16.msra.mxu3 %v519_v46  ;;  %v448_v62 = vsel %vm236_vm8, %v444_v47, %v446_v57  ;;  %v515_v63 = vsel %vm302_vm0, %v885_v15, %v446_v57  ;;  %v219_v15 = vld [vmem:[%s1039_s2] sm:$0x7] }
  0xf3   : > { %v511_v0 = vsel %vm302_vm0, %v856_v11, %v448_v62  ;;  %v408_v1 = vperm.slane %v219_v15, 0  ;;  %v409_v2 = vperm.slane %v219_v15, 1  ;;  %v410_v10 = vperm.slane %v219_v15, 2 }
  0xf6   : > { %v442_v48 = vpop.permute.xlu1 %441 }
  0xf7   : > { %v447_v49 = vsel %vm236_vm8, %v442_v48, %v444_v47  ;;  %v478_v50 = vpop.permute.xlu0 %477 }
  0xf8   : > { %v480_v52 = vsel %vm272_vm5, %v476_v31, %v478_v50  ;;  %v539_v53 = vsel %vm302_vm0, %v470_v41, %v478_v50  ;;  %v507_v54 = vsel %vm302_vm0, %v858_v12, %v447_v49 }
  0xf9   : > { %593 = vmatpush.bf16.msrb.mxu1 %v539_v53  ;;  %569 = vmatpush.bf16.msra.mxu3 %v507_v54  ;;  %v535_v55 = vsel %vm302_vm0, %v472_v51, %v480_v52 }
  0xfa   : > { %580 = vmatpush.bf16.msrb.mxu0 %v535_v55 }
  0xfc   : > { %731 = vmatmul.msk.bf16.vlgmr.msra.gmra.mxu3 %vm351_vm9, %v962_v24 }
  0xfe   : > { %v462_v56 = vpop.permute.xlu1 %461 }
  0xff   : > { %v464_v58 = vsel %vm254_vm6, %v460_v42, %v462_v56  ;;  %v454_v59 = vpop.permute.xlu0 %453 }
 0x100   : > { %v456_v60 = vsel %vm245_vm7, %v452_v6, %v454_v59  ;;  %v527_v61 = vsel %vm302_vm0, %v454_v59, %v462_v56 }
 0x101   : > { %594 = vmatpush.bf16.msrb.mxu1 %v527_v61  ;;  %v523_v12 = vsel %vm302_vm0, %v456_v60, %v464_v58 }
 0x102   : > { %581 = vmatpush.bf16.msrb.mxu0 %v523_v12 }
 0x105   : > { %595 = vmatpush.bf16.msrb.mxu1 %v515_v63 }
 0x106   : > { %582 = vmatpush.bf16.msrb.mxu0 %v511_v0 }
 0x108   : > { %733 = vmatmul.msk.bf16.vlgmr.msrb.gmra.mxu1 %vm351_vm9, %v962_v24 }
 0x109   : > { %732 = vmatmul.msk.bf16.vlgmr.msrb.gmra.mxu0 %vm351_vm9, %v962_v24 }
 0x152   : > { %v373_v11 = vpop.f32.mrf.mxu0 }
 0x153   : > { %403 = vst [vmem:[%s1012_s9] sm:$0xff] %v373_v11  ;;  %v414_v3 = vmul.f32 %v408_v1, %v373_v11 }
 0x155   : > { %v422_v13 = vmul.f32 %v414_v3, %v373_v11 }
 0x15a   : > { %v386_v4 = vpop.f32.mrf.mxu1  ;;  %v375_v8 = vpop.f32.mrf.mxu0 }
 0x15b   : > { %404 = vst [vmem:[%s1012_s9 + $0x8] sm:$0xff] %v386_v4  ;;  %v415_v9 = vmul.f32 %v409_v2, %v386_v4 }
 0x15d   : > { %v423_v14 = vmul.f32 %v415_v9, %v386_v4  ;;  %v417_v17 = vadd.f32 %v415_v9, %v414_v3 }
 0x15f   : > { %v399_v16 = vpop.f32.mrf.mxu2  ;;  %v425_v19 = vadd.f32 %v423_v14, %v422_v13 }
 0x160   : > { %406 = vst.msk [vmem:[%s1012_s9 + $0x10] sm:$0xff] %vm405_vm10, %v399_v16  ;;  %v416_v18 = vmul.f32 %v410_v10, %v399_v16 }
 0x162   : > { %v424_v20 = vmul.f32 %v416_v18, %v399_v16  ;;  %v388_v21 = vpop.f32.mrf.mxu1  ;;  %v418_v22 = vsel %vm405_vm10, %v416_v18, 0.0 }
 0x163   : > { %v419_v23 = vadd.f32 %v418_v22, %v417_v17 }
 0x164   : > { %v426_v24 = vsel %vm405_vm10, %v424_v20, 0.0 }
 0x165   : > { %v427_v25 = vadd.f32 %v426_v24, %v425_v19  ;;  %420 = vadd.xlane.f32.xlu0 %v419_v23 }
 0x167   : > { %428 = vadd.xlane.f32.xlu1 %v427_v25  ;;  %v401_v26 = vpop.f32.mrf.mxu2 }
 0x17f   : > { %v571_v27 = vpop.f32.mrf.mxu3 }
 0x180   : > { %734 = vst [vmem:[%s1012_s9 + $0x18] sm:$0xff] %v571_v27  ;;  %v605_v30 = vmul.f32 %v571_v27, %v408_v1 }
 0x182   : > { %v613_v35 = vmul.f32 %v605_v30, %v571_v27 }
 0x185   : > { %v597_v7 = vpop.f32.mrf.mxu1 }
 0x186   : > { %736 = vst.msk [vmem:[%s1012_s9 + $0x28] sm:$0xff] %vm405_vm10, %v597_v7  ;;  %v607_v28 = vmul.f32 %v597_v7, %v410_v10  ;;  %v584_v29 = vpop.f32.mrf.mxu0 }
 0x187   : > { %735 = vst [vmem:[%s1012_s9 + $0x20] sm:$0xff] %v584_v29  ;;  %v606_v31 = vmul.f32 %v584_v29, %v409_v2  ;;  %v573_v32 = vpop.f32.mrf.mxu3 }
 0x188   : > { %v609_v33 = vsel %vm405_vm10, %v607_v28, 0.0  ;;  %v615_v37 = vmul.f32 %v607_v28, %v597_v7 }
 0x189   : > { %v608_v5 = vadd.f32 %v606_v31, %v605_v30  ;;  %v614_v34 = vmul.f32 %v606_v31, %v584_v29 }
 0x18a   : > { %v617_v40 = vsel %vm405_vm10, %v615_v37, 0.0 }
 0x18b   : > { %v610_v6 = vadd.f32 %v609_v33, %v608_v5  ;;  %v616_v39 = vadd.f32 %v614_v34, %v613_v35 }
 0x18d   : > { %v599_v36 = vpop.f32.mrf.mxu1  ;;  %611 = vadd.xlane.f32.xlu2 %v610_v6  ;;  %v618_v41 = vadd.f32 %v617_v40, %v616_v39 }
 0x18e   : > { %v586_v38 = vpop.f32.mrf.mxu0 }
 0x195   : > { %619 = vadd.xlane.f32.xlu2 %v618_v41 }
 0x1d8   : > { %v421_v43 = vpop.xlane.xlu0 %420 }
 0x1da   : > { %v429_v44 = vpop.xlane.xlu1 %428 }
 0x200   : > { %v612_v42 = vpop.xlane.xlu2 %611 }
 0x201   : > { %v621_v46 = vadd.f32 %v612_v42, %v421_v43 }
 0x208   : > { %v620_v45 = vpop.xlane.xlu2 %619 }
 0x209   : > { %v622_v47 = vadd.f32 %v620_v45, %v429_v44 }
 0x20b   : > { %v624_v48 = vsel %vm623_vm11, %v621_v46, %v622_v47 }
 0x20c   : > { %626 = vst.msk [vmem:[%s216_s17] sm:$0xff] %vm625_vm12, %v624_v48 }
 0x20d PF: > { %s15_s15 = sadd.s32 1, %s763_s15  }
 0x20e   : > { %p12_p5 = scmp.ge.s32.totalorder %s15_s15, 4  }
 0x210   :  { %14 = sbr.rel (!%p12_p5) target bundleno = 1 (0x1), region = 76 }

// kernel: cnn_block_forward.4
= control target key start
LH: loop header
LB: loop body
LE: loop exit
PB: predicated region body
PF: predicated region fallthrough
CT: control target
= control target key end

     0   :  { %s914_s21 = smov 0   ;;  %s1170_s0 = inlined_call_operand.vmem [shape: f32[4,8,326], index: 0, kind: input, shape index: {}]   ;;  %s1171_s1 = inlined_call_operand.vmem [shape: bf16[8,72], index: 1, kind: input, shape index: {}]   ;;  %s1172_s2 = inlined_call_operand.vmem [shape: f32[1,288], index: 2, kind: input, shape index: {}]   ;;  %s1173_s3 = inlined_call_operand.vmem [shape: f32[8,1], index: 3, kind: input, shape index: {}]   ;;  %s1174_s4 = inlined_call_operand.vmem [shape: f32[8,1], index: 4, kind: input, shape index: {}]   ;;  %s1175_s5 = inlined_call_operand.vmem [shape: f32[4,8,288], index: 5, kind: output, shape index: {0}]   ;;  %s1176_s6 = inlined_call_operand.vmem [shape: f32[2,8,2], index: 6, kind: output, shape index: {1}]  }
   0x1 LB: > { %s920_s22 = sadd.s32 4294967295, %s868_s21   ;;  %p822_p0 = scmp.ge.s32.totalorder %s868_s21, 1  ;;  %s868_s21 = sphi %s914_s21, %s17_s21  }
   0x2   : > { %p217_p1 = scmp.lt.s32.totalorder %s868_s21, 3 }
   0x4   : > { %p218_p2 = pnand %p822_p0, %p217_p1 }
   0x5   : > { %s823_s27 = sshll.u32 (!%p218_p2), %s920_s22, 1  ;;  %s871_s8 = smov (!%p218_p2), 90  }
   0x6   : > { %221 = sbr.rel (%p218_p2) target bundleno = 640 (0x280), region = 40  ;;  %p254_p3 = scmp.lt.s32.totalorder (!%p218_p2), %s823_s27, 3 }
   0x7   : > { %s872_s9 = smov (!%p218_p2), 92   ;;  %s873_s10 = smov (!%p218_p2), 91  }
   0x8   : > { %s874_s11 = smov (!%p218_p2), 109   ;;  %s875_s12 = smov (!%p218_p2), 108  }
   0x9   : > { %s876_s13 = smov (!%p218_p2), 126   ;;  %s877_s14 = smov (!%p218_p2), 110  }
   0xa   : > { %s878_s15 = smov (!%p218_p2), 127   ;;  %p267_p4 = scmp.lt.s32.totalorder (!%p218_p2), %s920_s22, 1 }
   0xb   : > { %v277_v0 = vld [vmem:[%s1173_s3] sm:$0xff]  ;;  %v870_v1 = vmov 0   ;;  %s1178_s27 = smov (!%p254_p3, %s823_s27), 3  ;;  %vm377_vm0 = vcmask 736256   ;;  %vm380_vm1 = vcmask 1043456   ;;  %vm359_vm2 = vcmask 752640  }
   0xc   : > { %860 = vset.pattern.permute.xlu0 %v870_v1  ;;  %861 = vset.pattern.permute.xlu1 %v870_v1  ;;  %v286_v2 = vld [vmem:[%s1174_s4] sm:$0xff]  ;;  %s842_s28 = smul.u32 24, %s1178_s27  ;;  %vm368_vm3 = vcmask 744448   ;;  %vm341_vm4 = vcmask 891904   ;;  %vm350_vm5 = vcmask 883712   ;;  %vm323_vm6 = vcmask 1031168  }
   0xd   : > { %280 = vperm.xlu0 %860, %v277_v0   ;;  %515 = vperm.xlu1 %861, %v277_v0   ;;  %vm332_vm7 = vcmask 900096   ;;  %vm314_vm8 = vcmask 1039360   ;;  %vm429_vm9 = vcmask 588800   ;;  %vm483_vm10 = vcmask 261120   ;;  %s1180_s22 = smov (!%p267_p4, %s920_s22), 1 }
   0xe   : > { %s939_s7 = scalar_lea.vmem %s1170_s0, %s842_s28  ;;  %s1145_s20 = scalar_lea.vmem %s1175_s5, %s842_s28  ;;  %vm725_vm11 = vcmask 7168   ;;  %vm727_vm12 = vcmask 15360  }
   0xf   : > { %v274_v4 = vld [vmem:[%s939_s7] sm:$0xff]  ;;  %v275_v5 = vld [vmem:[%s939_s7 + $0x8] sm:$0xff]  ;;  %v276_v6 = vld [vmem:[%s939_s7 + $0x10] sm:$0xff]  ;;  %s827_s25 = sshll.u32 %s1180_s22, 3 }
  0x10   : > { %v831_v26 = vld [vmem:[%s939_s7 + $0x18] sm:$0xff]  ;;  %v832_v27 = vld [vmem:[%s939_s7 + $0x20] sm:$0xff]  ;;  %v833_v39 = vld [vmem:[%s939_s7 + $0x28] sm:$0xff]  ;;  %s270_s28 = scalar_lea.vmem %s1176_s6, %s827_s25 }
  0x15   : > { %289 = vperm.xlu0 %860, %v286_v2   ;;  %524 = vperm.xlu1 %861, %v286_v2  }
  0x7f   : > { %v281_v3 = vpop.permute.xlu0 %280  ;;  %v516_v23 = vpop.permute.xlu1 %515 }
  0x80   : > { %v283_v7 = vmul.f32 %v281_v3, %v274_v4  ;;  %v284_v8 = vmul.f32 %v281_v3, %v275_v5  ;;  %v285_v9 = vmul.f32 %v281_v3, %v276_v6  ;;  %v518_v28 = vmul.f32 %v831_v26, %v516_v23 }
  0x81   : > { %v519_v29 = vmul.f32 %v832_v27, %v516_v23  ;;  %v520_v41 = vmul.f32 %v833_v39, %v516_v23 }
  0x87   : > { %v290_v10 = vpop.permute.xlu0 %289  ;;  %v525_v30 = vpop.permute.xlu1 %524 }
  0x88   : > { %v292_v11 = vadd.f32 %v290_v10, %v283_v7  ;;  %v293_v12 = vadd.f32 %v290_v10, %v284_v8  ;;  %v294_v13 = vadd.f32 %v290_v10, %v285_v9  ;;  %v527_v31 = vadd.f32 %v525_v30, %v518_v28 }
  0x89   : > { %v528_v32 = vadd.f32 %v525_v30, %v519_v29  ;;  %v529_v42 = vadd.f32 %v525_v30, %v520_v41 }
  0x8a   : > { %v295_v14 = vmax.f32 %v292_v11, 0.0  ;;  %v296_v15 = vmax.f32 %v293_v12, 0.0  ;;  %v297_v16 = vmax.f32 %v294_v13, 0.0  ;;  %v530_v33 = vmax.f32 %v527_v31, 0.0 }
  0x8b   : > { %v531_v34 = vmax.f32 %v528_v32, 0.0  ;;  %v532_v43 = vmax.f32 %v529_v42, 0.0 }
  0x8c   : > { %v298_v17 = vpack.c.bf16 %v296_v15, %v295_v14  ;;  %v299_v18 = vpack.c.bf16 %v297_v16, %v297_v16 }
  0x8d   : > { %v533_v35 = vpack.c.bf16 %v531_v34, %v530_v33  ;;  %v534_v44 = vpack.c.bf16 %v532_v43, %v532_v43 }
  0x8e   : > { %v302_v19 = vunpack.c.l.b16 %v298_v17  ;;  %v304_v20 = vunpack.c.l.b16 %v299_v18  ;;  %v303_v24 = vunpack.c.h.b16 %v298_v17 }
  0x8f   : > { %v537_v36 = vunpack.c.l.b16 %v533_v35  ;;  %v538_v38 = vunpack.c.h.b16 %v533_v35  ;;  %v539_v45 = vunpack.c.l.b16 %v534_v44 }
  0x90   : > { %v944_v21 = vpack.c.b16 %v302_v19, %v302_v19  ;;  %v946_v22 = vpack.c.b16 %v304_v20, %v304_v20  ;;  %v954_v25 = vpack.c.b16 %v303_v24, %v303_v24 }
  0x91   : > { %v976_v37 = vpack.c.b16 %v537_v36, %v537_v36  ;;  %v991_v40 = vpack.c.b16 %v538_v38, %v538_v38  ;;  %v1011_v46 = vpack.c.b16 %v539_v45, %v539_v45 }
  0x92   : > { %375 = vrot.lane.b32.xlu0 %v946_v22, %s871_s8  ;;  %353 = vrot.lane.b32.xlu1 %v944_v21, %s872_s9 }
  0x93   : > { %371 = vrot.lane.b32.xlu2 %v944_v21, %s871_s8 }
  0x9a   : > { %362 = vrot.lane.b32.xlu0 %v944_v21, %s873_s10  ;;  %364 = vrot.lane.b32.xlu1 %v954_v25, %s873_s10 }
  0x9b   : > { %373 = vrot.lane.b32.xlu2 %v954_v25, %s871_s8 }
  0xa2   : > { %366 = vrot.lane.b32.xlu0 %v946_v22, %s873_s10  ;;  %335 = vrot.lane.b32.xlu1 %v944_v21, %s874_s11 }
  0xa3   : > { %355 = vrot.lane.b32.xlu2 %v954_v25, %s872_s9 }
  0xaa   : > { %344 = vrot.lane.b32.xlu0 %v944_v21, %s875_s12  ;;  %346 = vrot.lane.b32.xlu1 %v954_v25, %s875_s12 }
  0xab   : > { %357 = vrot.lane.b32.xlu2 %v946_v22, %s872_s9 }
  0xb2   : > { %348 = vrot.lane.b32.xlu0 %v946_v22, %s875_s12  ;;  %599 = vrot.lane.b32.xlu1 %v976_v37, %s871_s8 }
  0xb3   : > { %337 = vrot.lane.b32.xlu2 %v954_v25, %s874_s11 }
  0xba   : > { %317 = vrot.lane.b32.xlu0 %v944_v21, %s876_s13  ;;  %319 = vrot.lane.b32.xlu1 %v954_v25, %s876_s13 }
  0xbb   : > { %339 = vrot.lane.b32.xlu2 %v946_v22, %s874_s11 }
  0xc2   : > { %328 = vrot.lane.b32.xlu0 %v954_v25, %s877_s14  ;;  %321 = vrot.lane.b32.xlu1 %v946_v22, %s876_s13 }
  0xc3   : > { %601 = vrot.lane.b32.xlu2 %v991_v40, %s871_s8 }
  0xca   : > { %583 = vrot.lane.b32.xlu0 %v976_v37, %s872_s9  ;;  %585 = vrot.lane.b32.xlu1 %v991_v40, %s872_s9 }
  0xcb   : > { %326 = vrot.lane.b32.xlu2 %v944_v21, %s877_s14 }
  0xd2   : > { %593 = vrot.lane.b32.xlu0 %v991_v40, %s873_s10  ;;  %308 = vrot.lane.b32.xlu1 %v944_v21, %s878_s15 }
  0xd3   : > { %330 = vrot.lane.b32.xlu2 %v946_v22, %s877_s14 }
  0xda   : > { %603 = vrot.lane.b32.xlu0 %v1011_v46, %s871_s8  ;;  %312 = vrot.lane.b32.xlu1 %v946_v22, %s878_s15 }
  0xdb   : > { %591 = vrot.lane.b32.xlu2 %v976_v37, %s873_s10 }
  0xe2   : > { %569 = vrot.lane.b32.xlu0 %v991_v40, %s874_s11  ;;  %575 = vrot.lane.b32.xlu1 %v976_v37, %s875_s12 }
  0xe3   : > { %310 = vrot.lane.b32.xlu2 %v954_v25, %s878_s15 }
  0xea   : > { %587 = vrot.lane.b32.xlu0 %v1011_v46, %s872_s9  ;;  %595 = vrot.lane.b32.xlu1 %v1011_v46, %s873_s10 }
  0xeb   : > { %567 = vrot.lane.b32.xlu2 %v976_v37, %s874_s11 }
  0xed   : > { %v372_v47 = vpop.permute.xlu2 %371 }
  0xf2   : > { %553 = vrot.lane.b32.xlu0 %v991_v40, %s876_s13  ;;  %559 = vrot.lane.b32.xlu1 %v976_v37, %s877_s14 }
  0xf3   : > { %577 = vrot.lane.b32.xlu2 %v991_v40, %s875_s12 }
  0xf5   : > { %v374_v48 = vpop.permute.xlu2 %373 }
  0xf6   : > { %v378_v49 = vsel %vm377_vm0, %v372_v47, %v374_v48 }
  0xf7   : > { %v434_v50 = vsel %vm380_vm1, %v378_v49, 0 }
  0xf8   : > { %445 = vmatpush.bf16.msra.mxu0 %v434_v50 }
  0xfa   : > { %571 = vrot.lane.b32.xlu0 %v1011_v46, %s874_s11  ;;  %579 = vrot.lane.b32.xlu1 %v1011_v46, %s875_s12 }
  0xfb   : > { %551 = vrot.lane.b32.xlu2 %v976_v37, %s876_s13 }
  0xfd   : > { %v356_v51 = vpop.permute.xlu2 %355 }
 0x102   : > { %545 = vrot.lane.b32.xlu0 %v991_v40, %s878_s15  ;;  %555 = vrot.lane.b32.xlu1 %v1011_v46, %s876_s13 }
 0x103   : > { %561 = vrot.lane.b32.xlu2 %v991_v40, %s877_s14 }
 0x104   : > { %v376_v52 = vpop.permute.xlu0 %375  ;;  %v354_v53 = vpop.permute.xlu1 %353 }
 0x105   : > { %v358_v54 = vpop.permute.xlu2 %357  ;;  %v440_v55 = vsel %vm380_vm1, %v376_v52, 0  ;;  %v379_v56 = vsel %vm377_vm0, %v374_v48, %v376_v52  ;;  %v360_v60 = vsel %vm359_vm2, %v354_v53, %v356_v51  ;;  %v1092_v52 = vld [vmem:[%s1171_s1] sm:$0xf] }
 0x106   : > { %471 = vmatpush.bf16.msra.mxu2 %v440_v55  ;;  %v437_v57 = vsel %vm380_vm1, %v379_v56, 0  ;;  %v361_v2 = vsel %vm359_vm2, %v356_v51, %v358_v54 }
 0x107   : > { %458 = vmatpush.bf16.msra.mxu1 %v437_v57 }
 0x10a   : > { %547 = vrot.lane.b32.xlu0 %v1011_v46, %s878_s15 }
 0x10b   : > { %543 = vrot.lane.b32.xlu2 %v976_v37, %s878_s15 }
 0x10c   : > { %v363_v58 = vpop.permute.xlu0 %362  ;;  %v365_v59 = vpop.permute.xlu1 %364 }
 0x10d   : > { %v369_v61 = vsel %vm368_vm3, %v363_v58, %v365_v59  ;;  %v338_v62 = vpop.permute.xlu2 %337 }
 0x10e   : > { %v419_v63 = vsel %vm380_vm1, %v360_v60, %v369_v61 }
 0x10f   : > { %446 = vmatpush.bf16.msra.mxu0 %v419_v63 }
 0x113   : > { %563 = vrot.lane.b32.xlu2 %v1011_v46, %s877_s14 }
 0x114   : > { %v367_v0 = vpop.permute.xlu0 %366  ;;  %v336_v1 = vpop.permute.xlu1 %335 }
 0x115   : > { %v370_v3 = vsel %vm368_vm3, %v365_v59, %v367_v0  ;;  %v340_v4 = vpop.permute.xlu2 %339  ;;  %v427_v5 = vsel %vm380_vm1, %v358_v54, %v367_v0  ;;  %v342_v9 = vsel %vm341_vm4, %v336_v1, %v338_v62 }
 0x116   : > { %472 = vmatpush.bf16.msra.mxu2 %v427_v5  ;;  %v423_v6 = vsel %vm380_vm1, %v361_v2, %v370_v3  ;;  %v343_v15 = vsel %vm341_vm4, %v338_v62, %v340_v4 }
 0x117   : > { %459 = vmatpush.bf16.msra.mxu1 %v423_v6 }
 0x11c   : > { %v345_v7 = vpop.permute.xlu0 %344  ;;  %v347_v8 = vpop.permute.xlu1 %346 }
 0x11d   : > { %v351_v10 = vsel %vm350_vm5, %v345_v7, %v347_v8  ;;  %v602_v11 = vpop.permute.xlu2 %601 }
 0x11e   : > { %v407_v12 = vsel %vm380_vm1, %v342_v9, %v351_v10 }
 0x11f   : > { %447 = vmatpush.bf16.msra.mxu0 %v407_v12 }
 0x124   : > { %v349_v13 = vpop.permute.xlu0 %348  ;;  %v600_v14 = vpop.permute.xlu1 %599 }
 0x125   : > { %v352_v16 = vsel %vm350_vm5, %v347_v8, %v349_v13  ;;  %v327_v17 = vpop.permute.xlu2 %326  ;;  %v415_v18 = vsel %vm380_vm1, %v340_v4, %v349_v13  ;;  %v605_v19 = vsel %vm377_vm0, %v600_v14, %v602_v11 }
 0x126   : > { %473 = vmatpush.bf16.msra.mxu2 %v415_v18  ;;  %v411_v20 = vsel %vm380_vm1, %v343_v15, %v352_v16  ;;  %v656_v23 = vsel %vm380_vm1, %v605_v19, 0 }
 0x127   : > { %460 = vmatpush.bf16.msra.mxu1 %v411_v20  ;;  %667 = vmatpush.bf16.msra.mxu3 %v656_v23 }
 0x12c   : > { %v318_v24 = vpop.permute.xlu0 %317  ;;  %v320_v26 = vpop.permute.xlu1 %319 }
 0x12d   : > { %v331_v27 = vpop.permute.xlu2 %330  ;;  %v324_v28 = vsel %vm323_vm6, %v318_v24, %v320_v26 }
 0x134   : > { %v329_v29 = vpop.permute.xlu0 %328  ;;  %v322_v30 = vpop.permute.xlu1 %321 }
 0x135   : > { %v333_v31 = vsel %vm332_vm7, %v327_v17, %v329_v29  ;;  %v334_v32 = vsel %vm332_vm7, %v329_v29, %v331_v27  ;;  %v325_v33 = vsel %vm323_vm6, %v320_v26, %v322_v30  ;;  %v592_v34 = vpop.permute.xlu2 %591  ;;  %v403_v35 = vsel %vm380_vm1, %v322_v30, %v331_v27 }
 0x136   : > { %474 = vmatpush.bf16.msra.mxu2 %v403_v35  ;;  %v395_v36 = vsel %vm380_vm1, %v324_v28, %v333_v31  ;;  %v399_v38 = vsel %vm380_vm1, %v325_v33, %v334_v32 }
 0x137   : > { %448 = vmatpush.bf16.msra.mxu0 %v395_v36  ;;  %461 = vmatpush.bf16.msra.mxu1 %v399_v38 }
 0x13c   : > { %v584_v39 = vpop.permute.xlu0 %583  ;;  %v586_v41 = vpop.permute.xlu1 %585 }
 0x13d   : > { %v311_v42 = vpop.permute.xlu2 %310  ;;  %v589_v45 = vsel %vm359_vm2, %v584_v39, %v586_v41 }
 0x144   : > { %v594_v43 = vpop.permute.xlu0 %593  ;;  %v309_v44 = vpop.permute.xlu1 %308 }
 0x145   : > { %v597_v47 = vsel %vm368_vm3, %v592_v34, %v594_v43  ;;  %v315_v48 = vsel %vm314_vm8, %v309_v44, %v311_v42  ;;  %v568_v49 = vpop.permute.xlu2 %567 }
 0x146   : > { %v383_v50 = vsel %vm380_vm1, %v944_v21, %v315_v48  ;;  %v645_v51 = vsel %vm380_vm1, %v589_v45, %v597_v47 }
 0x147   : > { %449 = vmatpush.bf16.msra.mxu0 %v383_v50  ;;  %668 = vmatpush.bf16.msra.mxu3 %v645_v51 }
 0x14a   : > { %828 = vmatmul.msk.bf16.vlgmr.msra.gmra.mxu0 %vm429_vm9, %v1092_v52 }
 0x14c   : > { %v604_v53 = vpop.permute.xlu0 %603  ;;  %v313_v54 = vpop.permute.xlu1 %312 }
 0x14d   : > { %v316_v55 = vsel %vm314_vm8, %v311_v42, %v313_v54  ;;  %v578_v56 = vpop.permute.xlu2 %577  ;;  %v391_v21 = vsel %vm380_vm1, %v946_v22, %v313_v54  ;;  %v606_v57 = vsel %vm377_vm0, %v602_v11, %v604_v53  ;;  %v662_v60 = vsel %vm380_vm1, %v604_v53, 0 }
 0x14e   : > { %475 = vmatpush.bf16.msra.mxu2 %v391_v21  ;;  %v387_v58 = vsel %vm380_vm1, %v954_v25, %v316_v55  ;;  %v659_v59 = vsel %vm380_vm1, %v606_v57, 0 }
 0x14f   : > { %462 = vmatpush.bf16.msra.mxu1 %v387_v58  ;;  %680 = vmatpush.bf16.msrb.mxu0 %v659_v59 }
 0x151   : > { %830 = vmatmul.msk.bf16.vlgmr.msra.gmra.mxu2 %vm429_vm9, %v1092_v52 }
 0x152   : > { %829 = vmatmul.msk.bf16.vlgmr.msra.gmra.mxu1 %vm429_vm9, %v1092_v52 }
 0x153   : > { %693 = vmatpush.bf16.msrb.mxu1 %v662_v60 }
 0x154   : > { %v570_v22 = vpop.permute.xlu0 %569  ;;  %v576_v61 = vpop.permute.xlu1 %575 }
 0x155   : > { %v573_v62 = vsel %vm341_vm4, %v568_v49, %v570_v22  ;;  %v581_v63 = vsel %vm350_vm5, %v576_v61, %v578_v56  ;;  %v552_v25 = vpop.permute.xlu2 %551 }
 0x156   : > { %v633_v0 = vsel %vm380_vm1, %v573_v62, %v581_v63 }
 0x157   : > { %669 = vmatpush.bf16.msra.mxu3 %v633_v0 }
 0x15c   : > { %v588_v1 = vpop.permute.xlu0 %587  ;;  %v596_v2 = vpop.permute.xlu1 %595 }
 0x15d   : > { %v590_v3 = vsel %vm359_vm2, %v586_v41, %v588_v1  ;;  %v598_v4 = vsel %vm368_vm3, %v594_v43, %v596_v2  ;;  %v653_v5 = vsel %vm380_vm1, %v588_v1, %v596_v2  ;;  %v562_v6 = vpop.permute.xlu2 %561 }
 0x15e   : > { %694 = vmatpush.bf16.msrb.mxu1 %v653_v5  ;;  %v649_v7 = vsel %vm380_vm1, %v590_v3, %v598_v4 }
 0x15f   : > { %681 = vmatpush.bf16.msrb.mxu0 %v649_v7 }
 0x164   : > { %v554_v8 = vpop.permute.xlu0 %553  ;;  %v560_v9 = vpop.permute.xlu1 %559 }
 0x165   : > { %v557_v10 = vsel %vm323_vm6, %v552_v25, %v554_v8  ;;  %v565_v11 = vsel %vm332_vm7, %v560_v9, %v562_v6  ;;  %v544_v13 = vpop.permute.xlu2 %543 }
 0x166   : > { %v621_v12 = vsel %vm380_vm1, %v557_v10, %v565_v11 }
 0x167   : > { %670 = vmatpush.bf16.msra.mxu3 %v621_v12 }
 0x16c   : > { %v572_v14 = vpop.permute.xlu0 %571  ;;  %v580_v15 = vpop.permute.xlu1 %579 }
 0x16d   : > { %v574_v16 = vsel %vm341_vm4, %v570_v22, %v572_v14  ;;  %v582_v17 = vsel %vm350_vm5, %v578_v56, %v580_v15  ;;  %v641_v18 = vsel %vm380_vm1, %v572_v14, %v580_v15  ;;  %v564_v20 = vpop.permute.xlu2 %563 }
 0x16e   : > { %695 = vmatpush.bf16.msrb.mxu1 %v641_v18  ;;  %v637_v19 = vsel %vm380_vm1, %v574_v16, %v582_v17  ;;  %v566_v26 = vsel %vm332_vm7, %v562_v6, %v564_v20 }
 0x16f   : > { %682 = vmatpush.bf16.msrb.mxu0 %v637_v19 }
 0x174   : > { %v546_v23 = vpop.permute.xlu0 %545  ;;  %v556_v24 = vpop.permute.xlu1 %555 }
 0x175   : > { %v549_v27 = vsel %vm314_vm8, %v544_v13, %v546_v23  ;;  %v558_v28 = vsel %vm323_vm6, %v554_v8, %v556_v24  ;;  %v629_v29 = vsel %vm380_vm1, %v556_v24, %v564_v20 }
 0x176   : > { %696 = vmatpush.bf16.msrb.mxu1 %v629_v29  ;;  %v609_v30 = vsel %vm380_vm1, %v976_v37, %v549_v27  ;;  %v625_v31 = vsel %vm380_vm1, %v558_v28, %v566_v26  ;;  %v273_v37 = vld [vmem:[%s1172_s2] sm:$0x7] }
 0x177   : > { %671 = vmatpush.bf16.msra.mxu3 %v609_v30  ;;  %683 = vmatpush.bf16.msrb.mxu0 %v625_v31  ;;  %v487_v36 = vperm.slane %v273_v37, 1  ;;  %v488_v43 = vperm.slane %v273_v37, 2 }
 0x17a   : > { %834 = vmatmul.msk.bf16.vlgmr.msra.gmra.mxu3 %vm429_vm9, %v1092_v52 }
 0x17c   : > { %v548_v32 = vpop.permute.xlu0 %547 }
 0x17d   : > { %v550_v33 = vsel %vm314_vm8, %v546_v23, %v548_v32  ;;  %v617_v34 = vsel %vm380_vm1, %v1011_v46, %v548_v32  ;;  %v486_v46 = vperm.slane %v273_v37, 0 }
 0x17e   : > { %697 = vmatpush.bf16.msrb.mxu1 %v617_v34  ;;  %v613_v35 = vsel %vm380_vm1, %v991_v40, %v550_v33 }
 0x17f   : > { %684 = vmatpush.bf16.msrb.mxu0 %v613_v35 }
 0x181   : > { %836 = vmatmul.msk.bf16.vlgmr.msrb.gmra.mxu1 %vm429_vm9, %v1092_v52 }
 0x182   : > { %835 = vmatmul.msk.bf16.vlgmr.msrb.gmra.mxu0 %vm429_vm9, %v1092_v52 }
 0x1c7   : > { %v451_v40 = vpop.f32.mrf.mxu0 }
 0x1c8   : > { %481 = vst [vmem:[%s1145_s20] sm:$0xff] %v451_v40  ;;  %v492_v38 = vmul.f32 %v486_v46, %v451_v40 }
 0x1ca   : > { %v500_v44 = vmul.f32 %v492_v38, %v451_v40 }
 0x1cf   : > { %v464_v39 = vpop.f32.mrf.mxu1  ;;  %v453_v41 = vpop.f32.mrf.mxu0 }
 0x1d0   : > { %482 = vst [vmem:[%s1145_s20 + $0x8] sm:$0xff] %v464_v39  ;;  %v493_v42 = vmul.f32 %v487_v36, %v464_v39 }
 0x1d2   : > { %v501_v45 = vmul.f32 %v493_v42, %v464_v39  ;;  %v495_v48 = vadd.f32 %v493_v42, %v492_v38 }
 0x1d4   : > { %v477_v47 = vpop.f32.mrf.mxu2  ;;  %v503_v50 = vadd.f32 %v501_v45, %v500_v44 }
 0x1d5   : > { %484 = vst.msk [vmem:[%s1145_s20 + $0x10] sm:$0xff] %vm483_vm10, %v477_v47  ;;  %v494_v49 = vmul.f32 %v488_v43, %v477_v47 }
 0x1d7   : > { %v502_v51 = vmul.f32 %v494_v49, %v477_v47  ;;  %v466_v52 = vpop.f32.mrf.mxu1  ;;  %v496_v53 = vsel %vm483_vm10, %v494_v49, 0.0 }
 0x1d8   : > { %v497_v54 = vadd.f32 %v496_v53, %v495_v48 }
 0x1d9   : > { %v504_v55 = vsel %vm483_vm10, %v502_v51, 0.0 }
 0x1da   : > { %v505_v56 = vadd.f32 %v504_v55, %v503_v50  ;;  %498 = vadd.xlane.f32.xlu1 %v497_v54 }
 0x1dc   : > { %506 = vadd.xlane.f32.xlu2 %v505_v56  ;;  %v479_v21 = vpop.f32.mrf.mxu2 }
 0x1fd   : > { %v673_v57 = vpop.f32.mrf.mxu3 }
 0x1fe   : > { %837 = vst [vmem:[%s1145_s20 + $0x18] sm:$0xff] %v673_v57  ;;  %v707_v58 = vmul.f32 %v673_v57, %v486_v46  ;;  %v699_v59 = vpop.f32.mrf.mxu1 }
 0x1ff   : > { %839 = vst.msk [vmem:[%s1145_s20 + $0x28] sm:$0xff] %vm483_vm10, %v699_v59  ;;  %v709_v60 = vmul.f32 %v699_v59, %v488_v43  ;;  %v686_v22 = vpop.f32.mrf.mxu0 }
 0x200   : > { %838 = vst [vmem:[%s1145_s20 + $0x20] sm:$0xff] %v686_v22  ;;  %v708_v61 = vmul.f32 %v686_v22, %v487_v36  ;;  %v715_v25 = vmul.f32 %v707_v58, %v673_v57 }
 0x201   : > { %v717_v62 = vmul.f32 %v709_v60, %v699_v59  ;;  %v711_v63 = vsel %vm483_vm10, %v709_v60, 0.0 }
 0x202   : > { %v716_v0 = vmul.f32 %v708_v61, %v686_v22  ;;  %v710_v1 = vadd.f32 %v708_v61, %v707_v58 }
 0x203   : > { %v719_v5 = vsel %vm483_vm10, %v717_v62, 0.0 }
 0x204   : > { %v712_v2 = vadd.f32 %v711_v63, %v710_v1  ;;  %v718_v3 = vadd.f32 %v716_v0, %v715_v25 }
 0x205   : > { %v675_v4 = vpop.f32.mrf.mxu3 }
 0x206   : > { %v701_v6 = vpop.f32.mrf.mxu1  ;;  %713 = vadd.xlane.f32.xlu0 %v712_v2  ;;  %v720_v7 = vadd.f32 %v719_v5, %v718_v3 }
 0x207   : > { %v688_v8 = vpop.f32.mrf.mxu0 }
 0x208   : > { %721 = vadd.xlane.f32.xlu2 %v720_v7 }
 0x24d   : > { %v499_v11 = vpop.xlane.xlu1 %498 }
 0x24f   : > { %v507_v9 = vpop.xlane.xlu2 %506 }
 0x279   : > { %v714_v10 = vpop.xlane.xlu0 %713 }
 0x27a   : > { %v723_v13 = vadd.f32 %v714_v10, %v499_v11 }
 0x27b   : > { %v722_v12 = vpop.xlane.xlu2 %721 }
 0x27c   : > { %v724_v14 = vadd.f32 %v722_v12, %v507_v9 }
 0x27e   : > { %v726_v15 = vsel %vm725_vm11, %v723_v13, %v724_v14 }
 0x27f   : > { %728 = vst.msk [vmem:[%s270_s28] sm:$0xff] %vm727_vm12, %v726_v15 }
 0x280 PF: > { %s17_s21 = sadd.s32 1, %s868_s21  }
 0x281   : > { %p14_p5 = scmp.ge.s32.totalorder %s17_s21, 4  }
 0x283   :  { %16 = sbr.rel (!%p14_p5) target bundleno = 1 (0x1), region = 84 }

// kernel: cnn_block_forward.5
= control target key start
LH: loop header
LB: loop body
LE: loop exit
PB: predicated region body
PF: predicated region fallthrough
CT: control target
= control target key end

     0   :  { %9 = vsyncpa [#allocation3], 0  ;;  %s1598_s0 = inlined_call_operand.vmem [shape: f32[4,64,36], index: 0, kind: input, shape index: {}]   ;;  %s1599_s1 = inlined_call_operand.vmem [shape: f32[64,1], index: 1, kind: input, shape index: {}]   ;;  %s1600_s2 = inlined_call_operand.vmem [shape: f32[64,1], index: 2, kind: input, shape index: {}]   ;;  %s1601_s3 = inlined_call_operand.vmem [shape: f32[4,36,8], index: 3, kind: input, shape index: {}]   ;;  %s1602_s4 = inlined_call_operand.hbm [shape: f32[4,64,8], index: 4, kind: output, shape index: {}]  }
   0x1   :  { %11 = vsyncpa [#allocation3 + $0x1], 0  ;;  %s1225_s15 = smov 0   ;;  %s1227_s16 = smov 0  }
   0x2   :  { %s1229_s17 = smov 0   ;;  %s1231_s18 = smov 0  }
   0x3 LB: > { %s1246_s19 = sadd.s32 4294967295, %s1195_s18   ;;  %s953_s20 = sadd.s32 4294967294, %s1195_s18   ;;  %s1195_s18 = sphi %s1231_s18, %s1608_s18   ;;  %s1191_s17 = sphi %s1229_s17, %s1607_s17   ;;  %s1187_s16 = sphi %s1227_s16, %s1606_s16   ;;  %s1183_s15 = sphi %s1225_s15, %s1605_s15  }
   0x4   : > { %s1250_s21 = sadd.s32 1, %s1195_s18   ;;  %s113_s22 = sadd.s32 1, %s1191_s17 }
   0x5   : > { %s110_s23 = ssub.s32 %s1195_s18, %s1250_s21  ;;  %p123_p0 = scmp.ne.s32.totalorder %s1191_s17, %s1187_s16 }
   0x6   : > { %p111_p1 = scmp.eq.s32.totalorder %s110_s23, 0  ;;  %p124_p2 = scmp.eq.s32.totalorder %s1246_s19, 1 }
   0x7   : > { %p129_p3 = scmp.ne.s32.totalorder %s1187_s16, %s1183_s15  ;;  %p130_p4 = scmp.eq.s32.totalorder %s953_s20, 1 }
   0x8   : > { %s1261_s24 = scalar_select %p111_p1, %s1191_s17, %s113_s22  }
   0x9   : > { %p1263_p5 = por %p124_p2, %p123_p0  ;;  %p1267_p6 = por %p130_p4, %p129_p3 }
   0xa   : > { %p956_p7 = scmp.ge.s32.totalorder %s1195_s18, 1  ;;  %p167_p8 = scmp.lt.s32.totalorder %s1195_s18, 3 }
   0xc   : > { %p168_p9 = pnand %p956_p7, %p167_p8 }
   0xd   : > { %s958_s22 = sshll.u32 (!%p168_p9), %s1246_s19, 1  ;;  %s1087_s5 = sshll.u32 (!%p168_p9), %s1246_s19, 7 }
   0xe   : > { %171 = sbr.rel (%p168_p9) target bundleno = 409 (0x199), region = 36  ;;  %p195_p10 = scmp.lt.s32.totalorder (!%p168_p9), %s958_s22, 3 }
   0xf   : > { %s887_s8 = scalar_lea.hbm (!%p168_p9), %s1602_s4, %s1087_s5  ;;  %s1153_s20 = scalar_lea.hbm (!%p168_p9), %s1602_s4, 256 }
  0x10   : > { %s890_s9 = sshll.u32 (!%p168_p9), %s887_s8, 4  ;;  %s891_s9 = int_to_ptr.hbm [resolvable:$true] %s890_s9 }
  0x11   : > { %s1147_s11 = sshra.s32 (!%p168_p9), %s891_s9, 4  ;;  %s1148_s11 = int_to_ptr.hbm [resolvable:$true] %s1147_s11 }
  0x12   : > { %s1149_s12 = scalar_lea.hbm (!%p168_p9), %s1148_s11, 128  ;;  %p1154_p0 = scmp.lt.s32.totalorder (!%p168_p9), %s1148_s11, %s1602_s4 }
  0x13   : > { %v203_v0 = vld [vmem:[%s1599_s1 + $0x8] sm:$0xff]  ;;  %v202_v1 = vld [vmem:[%s1599_s1] sm:$0xff]  ;;  %v1197_v2 = vmov 0   ;;  %v204_v3 = vld [vmem:[%s1599_s1 + $0x10] sm:$0xff]  ;;  %s1610_s22 = smov (!%p195_p10, %s958_s22), 3  ;;  %vm360_vm0 = vcmask 1043456   ;;  %p1150_p11 = scmp.ne.s32.totalorder %s1148_s11, %s1149_s12 }
  0x14   : > { %1131 = vset.pattern.permute.xlu1 %v1197_v2  ;;  %1130 = vset.pattern.permute.xlu0 %v1197_v2  ;;  %v211_v4 = vld [vmem:[%s1600_s2 + $0x8] sm:$0xff]  ;;  %v210_v5 = vld [vmem:[%s1600_s2] sm:$0xff]  ;;  %v212_v6 = vld [vmem:[%s1600_s2 + $0x10] sm:$0xff]  ;;  %s1085_s23 = sshll.u32 %s1610_s22, 6  ;;  %vm335_vm1 = vcmask 293888   ;;  %vm579_vm2 = vcmask 64512   ;;  %p1155_p1 = scmp.lt.s32.totalorder %s1153_s20, %s1149_s12 }
  0x15   : > { %233 = vperm.xlu1 %1131, %v203_v0   ;;  %228 = vperm.xlu0 %1130, %v202_v1   ;;  %v213_v7 = vld [vmem:[%s1600_s2 + $0x18] sm:$0xff]  ;;  %v206_v9 = vld [vmem:[%s1599_s1 + $0x20] sm:$0xff]  ;;  %v207_v10 = vld [vmem:[%s1599_s1 + $0x28] sm:$0xff]  ;;  %s1365_s10 = scalar_lea.vmem %s1598_s0, %s1085_s23  ;;  %p1151_p12 = pnand %p1150_p11, %p1263_p5 }
  0x16   : > { %1132 = vset.pattern.permute.xlu2 %v1197_v2  ;;  %v205_v8 = vld [vmem:[%s1599_s1 + $0x18] sm:$0xff]  ;;  %v214_v11 = vld [vmem:[%s1600_s2 + $0x20] sm:$0xff]  ;;  %v215_v12 = vld [vmem:[%s1600_s2 + $0x28] sm:$0xff]  ;;  %p1156_p2 = por %p1155_p1, %p1154_p0 }
  0x17   : > { %238 = vperm.xlu2 %1132, %v204_v3   ;;  %v216_v13 = vld [vmem:[%s1600_s2 + $0x30] sm:$0xff]  ;;  %v209_v15 = vld [vmem:[%s1599_s1 + $0x38] sm:$0xff]  ;;  %v334_v17 = vld [vmem:[%s1601_s3 + $0x20] sm:$0xf]  ;;  %p1152_p13 = pneg %p1151_p12 }
  0x18   : > { %v208_v14 = vld [vmem:[%s1599_s1 + $0x30] sm:$0xff]  ;;  %v217_v16 = vld [vmem:[%s1600_s2 + $0x38] sm:$0xff]  ;;  %v974_v18 = vld [vmem:[%s1601_s3 + $0x48] sm:$0xf]  ;;  %961 = vmatpush.msk.msra.mxu0 %vm360_vm0, %v334_v17 }
  0x19   : > { %975 = vmatpush.msk.msra.mxu1 %vm360_vm0, %v974_v18  ;;  %v988_v19 = vld [vmem:[%s1601_s3 + $0x70] sm:$0xf]  ;;  %v1002_v20 = vld [vmem:[%s1601_s3 + $0x98] sm:$0xf]  ;;  %v973_v22 = vld [vmem:[%s1601_s3 + $0x40] sm:$0xff]  ;;  %p1157_p3 = pnand %p1156_p2, %p1152_p13 }
  0x1a   : > { %v333_v21 = vld [vmem:[%s1601_s3 + $0x18] sm:$0xff]  ;;  %989 = vmatpush.msk.msra.mxu2 %vm360_vm0, %v988_v19  ;;  %1003 = vmatpush.msk.msra.mxu3 %vm360_vm0, %v1002_v20  ;;  %v987_v23 = vld [vmem:[%s1601_s3 + $0x68] sm:$0xff]  ;;  %v1001_v24 = vld [vmem:[%s1601_s3 + $0x90] sm:$0xff] }
  0x1b   : > { %376 = vmatpush.msra.mxu0 %v333_v21  ;;  %426 = vmatpush.msra.mxu1 %v973_v22  ;;  %v332_v25 = vld [vmem:[%s1601_s3 + $0x10] sm:$0xff]  ;;  %v972_v26 = vld [vmem:[%s1601_s3 + $0x38] sm:$0xff]  ;;  %v986_v27 = vld [vmem:[%s1601_s3 + $0x60] sm:$0xff] }
  0x1c   : > { %476 = vmatpush.msra.mxu2 %v987_v23  ;;  %526 = vmatpush.msra.mxu3 %v1001_v24  ;;  %v1000_v28 = vld [vmem:[%s1601_s3 + $0x88] sm:$0xff]  ;;  %v1014_v29 = vld [vmem:[%s1365_s10 + $0x50] sm:$0xff]  ;;  %v985_v32 = vld [vmem:[%s1601_s3 + $0x58] sm:$0xff] }
  0x1d   : > { %281 = vperm.xlu1 %1131, %v211_v4   ;;  %276 = vperm.xlu0 %1130, %v210_v5   ;;  %v331_v30 = vld [vmem:[%s1601_s3 + $0x8] sm:$0xff]  ;;  %v971_v31 = vld [vmem:[%s1601_s3 + $0x30] sm:$0xff]  ;;  %v999_v34 = vld [vmem:[%s1601_s3 + $0x80] sm:$0xff] }
  0x1e   : > { %377 = vmatpush.msra.mxu0 %v332_v25  ;;  %427 = vmatpush.msra.mxu1 %v972_v26  ;;  %v330_v36 = vld [vmem:[%s1601_s3] sm:$0xff]  ;;  %v970_v37 = vld [vmem:[%s1601_s3 + $0x28] sm:$0xff]  ;;  %v984_v38 = vld [vmem:[%s1601_s3 + $0x50] sm:$0xff] }
  0x1f   : > { %286 = vperm.xlu2 %1132, %v212_v6   ;;  %477 = vmatpush.msra.mxu2 %v986_v27  ;;  %v998_v39 = vld [vmem:[%s1601_s3 + $0x78] sm:$0xff]  ;;  %v1047_v40 = vld [vmem:[%s1601_s3 + $0x70] sm:$0xf]  ;;  %v625_v44 = vld [vmem:[%s1601_s3 + $0x20] sm:$0xf] }
  0x20   : > { %527 = vmatpush.msra.mxu3 %v1000_v28  ;;  %378 = vmatpush.msra.mxu0 %v331_v30  ;;  %v1061_v41 = vld [vmem:[%s1601_s3 + $0x98] sm:$0xf]  ;;  %v1033_v45 = vld [vmem:[%s1601_s3 + $0x48] sm:$0xf]  ;;  %v1016_v46 = vld [vmem:[%s1365_s10 + $0x60] sm:$0xff] }
  0x21   : > { %428 = vmatpush.msra.mxu1 %v971_v31  ;;  %478 = vmatpush.msra.mxu2 %v985_v32  ;;  %v1013_v49 = vld [vmem:[%s1365_s10 + $0x48] sm:$0xff]  ;;  %v1012_v50 = vld [vmem:[%s1365_s10 + $0x40] sm:$0xff]  ;;  %v1019_v0 = vld [vmem:[%s1365_s10 + $0x78] sm:$0xff] }
  0x22   : > { %528 = vmatpush.msra.mxu3 %v999_v34  ;;  %379 = vmatpush.msra.mxu0 %v330_v36  ;;  %v218_v56 = vld [vmem:[%s1365_s10] sm:$0xff]  ;;  %v219_v58 = vld [vmem:[%s1365_s10 + $0x8] sm:$0xff]  ;;  %v1015_v5 = vld [vmem:[%s1365_s10 + $0x58] sm:$0xff] }
  0x23   : > { %429 = vmatpush.msra.mxu1 %v970_v37  ;;  %479 = vmatpush.msra.mxu2 %v984_v38 }
  0x24   : > { %529 = vmatpush.msra.mxu3 %v998_v39  ;;  %1020 = vmatpush.msk.msrb.mxu0 %vm360_vm0, %v625_v44 }
  0x25   : > { %291 = vperm.xlu1 %1131, %v213_v7   ;;  %243 = vperm.xlu0 %1130, %v205_v8   ;;  %v220_v7 = vld [vmem:[%s1365_s10 + $0x10] sm:$0xff] }
  0x26   : > { %1048 = vmatpush.msk.msrb.mxu2 %vm360_vm0, %v1047_v40  ;;  %1062 = vmatpush.msk.msrb.mxu3 %vm360_vm0, %v1061_v41  ;;  %v224_v40 = vld [vmem:[%s1365_s10 + $0x30] sm:$0xff] }
  0x27   : > { %248 = vperm.xlu2 %1132, %v206_v9   ;;  %1034 = vmatpush.msk.msrb.mxu1 %vm360_vm0, %v1033_v45  ;;  %v225_v45 = vld [vmem:[%s1365_s10 + $0x38] sm:$0xff] }
  0x28   : > { %763 = vmatpush.msrb.mxu2 %v987_v23  ;;  %812 = vmatpush.msrb.mxu3 %v1001_v24  ;;  %v1018_v24 = vld [vmem:[%s1365_s10 + $0x70] sm:$0xff] }
  0x29   : > { %665 = vmatpush.msrb.mxu0 %v333_v21  ;;  %714 = vmatpush.msrb.mxu1 %v973_v22 }
  0x2a   : > { %764 = vmatpush.msrb.mxu2 %v986_v27  ;;  %813 = vmatpush.msrb.mxu3 %v1000_v28  ;;  %v222_v28 = vld [vmem:[%s1365_s10 + $0x20] sm:$0xff] }
  0x2b   : > { %666 = vmatpush.msrb.mxu0 %v332_v25  ;;  %715 = vmatpush.msrb.mxu1 %v972_v26 }
  0x2c   : > { %765 = vmatpush.msrb.mxu2 %v985_v32  ;;  %814 = vmatpush.msrb.mxu3 %v999_v34  ;;  %v223_v34 = vld [vmem:[%s1365_s10 + $0x28] sm:$0xff] }
  0x2d   : > { %253 = vperm.xlu1 %1131, %v207_v10   ;;  %296 = vperm.xlu0 %1130, %v214_v11  }
  0x2e   : > { %766 = vmatpush.msrb.mxu2 %v984_v38  ;;  %815 = vmatpush.msrb.mxu3 %v998_v39 }
  0x2f   : > { %301 = vperm.xlu2 %1132, %v215_v12   ;;  %667 = vmatpush.msrb.mxu0 %v331_v30 }
  0x30   : > { %716 = vmatpush.msrb.mxu1 %v971_v31 }
  0x31   : > { %668 = vmatpush.msrb.mxu0 %v330_v36 }
  0x32   : > { %717 = vmatpush.msrb.mxu1 %v970_v37 }
  0x35   : > { %306 = vperm.xlu1 %1131, %v216_v13   ;;  %258 = vperm.xlu0 %1130, %v208_v14   ;;  %v1017_v14 = vld [vmem:[%s1365_s10 + $0x68] sm:$0xff] }
  0x37   : > { %263 = vperm.xlu2 %1132, %v209_v15  }
  0x3d   : > { %311 = vperm.xlu0 %1130, %v217_v16   ;;  %v221_v16 = vld [vmem:[%s1365_s10 + $0x18] sm:$0xff]  ;;  %s191_s10 = sand.u32 1, %s1187_s16  }
  0x3e   : > { %s957_s29 = sshll.u32 %s191_s10, 7  ;;  %s875_s19 = scalar_lea.sflag [#allocation3], %s191_s10 }
  0x3f   : > { %s1530_s30 = scalar_lea.vmem [#allocation2], %s957_s29 }
  0x40   : > { %s888_s22 = sshll.u32 %s1530_s30, 4  ;;  %s889_s22 = int_to_ptr.vmem [resolvable:$true] %s888_s22 }
  0x71   : > { %v1377_v33 = vpop.permute.xlu2 %238 }
  0x72   : > { %v599_v35 = vmul.f32 %v1014_v29, %v1377_v33  ;;  %v268_v11 = vmul.f32 %v1377_v33, %v220_v7 }
  0x79   : > { %v287_v42 = vpop.permute.xlu2 %286 }
  0x7a   : > { %v1403_v43 = vadd.f32 %v599_v35, %v287_v42  ;;  %v316_v15 = vadd.f32 %v287_v42, %v268_v11 }
  0x7c   : > { %v324_v21 = vmax.f32 %v316_v15, 0.0 }
  0x81   : > { %v1414_v47 = vpop.permute.xlu2 %248 }
  0x82   : > { %v601_v48 = vmul.f32 %v1016_v46, %v1414_v47  ;;  %v270_v32 = vmul.f32 %v1414_v47, %v222_v28 }
  0x87   : > { %v234_v51 = vpop.permute.xlu1 %233  ;;  %v229_v52 = vpop.permute.xlu0 %228 }
  0x88   : > { %v598_v53 = vmul.f32 %v1013_v49, %v234_v51  ;;  %v597_v54 = vmul.f32 %v1012_v50, %v229_v52  ;;  %v266_v57 = vmul.f32 %v229_v52, %v218_v56  ;;  %v267_v2 = vmul.f32 %v234_v51, %v219_v58 }
  0x89   : > { %v1419_v55 = vpop.permute.xlu2 %301  ;;  %v615_v52 = vmax.f32 %v1403_v43, 0.0 }
  0x8f   : > { %v282_v59 = vpop.permute.xlu1 %281  ;;  %v277_v60 = vpop.permute.xlu0 %276 }
  0x90   : > { %v1423_v61 = vadd.f32 %v598_v53, %v282_v59  ;;  %v314_v62 = vadd.f32 %v277_v60, %v266_v57  ;;  %v1425_v63 = vadd.f32 %v597_v54, %v277_v60  ;;  %v315_v6 = vadd.f32 %v282_v59, %v267_v2 }
  0x91   : > { %v1428_v1 = vpop.permute.xlu2 %263 }
  0x92   : > { %v322_v3 = vmax.f32 %v314_v62, 0.0  ;;  %v604_v4 = vmul.f32 %v1019_v0, %v1428_v1  ;;  %v323_v12 = vmax.f32 %v315_v6, 0.0  ;;  %v273_v47 = vmul.f32 %v1428_v1, %v225_v45 }
  0x93   : > { %v613_v50 = vmax.f32 %v1425_v63, 0.0  ;;  %v614_v51 = vmax.f32 %v1423_v61, 0.0 }
  0x94   : > { %962 = vmatmul.msk.f32.vlgmr.msra.gmra.mxu0 %vm335_vm1, %v322_v3  ;;  %976 = vmatmul.msk.f32.vlgmr.msra.gmra.mxu1 %vm335_vm1, %v322_v3 }
  0x95   : > { %990 = vmatmul.msk.f32.vlgmr.msra.gmra.mxu2 %vm335_vm1, %v322_v3  ;;  %1004 = vmatmul.msk.f32.vlgmr.msra.gmra.mxu3 %vm335_vm1, %v322_v3 }
  0x97   : > { %v292_v8 = vpop.permute.xlu1 %291  ;;  %v244_v9 = vpop.permute.xlu0 %243 }
  0x98   : > { %v600_v10 = vmul.f32 %v1015_v5, %v244_v9  ;;  %v269_v22 = vmul.f32 %v244_v9, %v221_v16 }
  0x9a   : > { %v1438_v13 = vadd.f32 %v600_v10, %v292_v8  ;;  %v317_v25 = vadd.f32 %v292_v8, %v269_v22 }
  0x9c   : > { %963 = vmatmul.msk.f32.gmra.mxu0 %vm335_vm1, %v323_v12  ;;  %977 = vmatmul.msk.f32.gmra.mxu1 %vm335_vm1, %v323_v12  ;;  %v325_v30 = vmax.f32 %v317_v25, 0.0  ;;  %v616_v53 = vmax.f32 %v1438_v13, 0.0 }
  0x9d   : > { %991 = vmatmul.msk.f32.gmra.mxu2 %vm335_vm1, %v323_v12  ;;  %1005 = vmatmul.msk.f32.gmra.mxu3 %vm335_vm1, %v323_v12 }
  0x9f   : > { %v254_v17 = vpop.permute.xlu1 %253  ;;  %v297_v18 = vpop.permute.xlu0 %296 }
  0xa0   : > { %v602_v19 = vmul.f32 %v1017_v14, %v254_v17  ;;  %v1446_v20 = vadd.f32 %v601_v48, %v297_v18  ;;  %v318_v33 = vadd.f32 %v297_v18, %v270_v32  ;;  %v271_v37 = vmul.f32 %v254_v17, %v223_v34 }
  0xa2   : > { %v1449_v23 = vadd.f32 %v602_v19, %v1419_v55  ;;  %v326_v38 = vmax.f32 %v318_v33, 0.0  ;;  %v319_v39 = vadd.f32 %v1419_v55, %v271_v37  ;;  %v617_v43 = vmax.f32 %v1446_v20, 0.0 }
  0xa4   : > { %964 = vmatmul.msk.f32.gmra.mxu0 %vm335_vm1, %v324_v21  ;;  %978 = vmatmul.msk.f32.gmra.mxu1 %vm335_vm1, %v324_v21  ;;  %v327_v41 = vmax.f32 %v319_v39, 0.0  ;;  %v618_v54 = vmax.f32 %v1449_v23, 0.0 }
  0xa5   : > { %992 = vmatmul.msk.f32.gmra.mxu2 %vm335_vm1, %v324_v21  ;;  %1006 = vmatmul.msk.f32.gmra.mxu3 %vm335_vm1, %v324_v21 }
  0xa7   : > { %v259_v26 = vpop.permute.xlu0 %258  ;;  %v307_v29 = vpop.permute.xlu1 %306 }
  0xa8   : > { %v603_v27 = vmul.f32 %v1018_v24, %v259_v26  ;;  %v272_v42 = vmul.f32 %v259_v26, %v224_v40 }
  0xaa   : > { %v1457_v31 = vadd.f32 %v603_v27, %v307_v29  ;;  %v320_v44 = vadd.f32 %v307_v29, %v272_v42 }
  0xac   : > { %965 = vmatmul.msk.f32.gmra.mxu0 %vm335_vm1, %v325_v30  ;;  %979 = vmatmul.msk.f32.gmra.mxu1 %vm335_vm1, %v325_v30  ;;  %v328_v46 = vmax.f32 %v320_v44, 0.0  ;;  %v619_v55 = vmax.f32 %v1457_v31, 0.0 }
  0xad   : > { %993 = vmatmul.msk.f32.gmra.mxu2 %vm335_vm1, %v325_v30  ;;  %1007 = vmatmul.msk.f32.gmra.mxu3 %vm335_vm1, %v325_v30 }
  0xaf   : > { %v312_v35 = vpop.permute.xlu0 %311 }
  0xb0   : > { %v1465_v36 = vadd.f32 %v604_v4, %v312_v35  ;;  %v321_v48 = vadd.f32 %v312_v35, %v273_v47 }
  0xb2   : > { %v329_v49 = vmax.f32 %v321_v48, 0.0  ;;  %v620_v56 = vmax.f32 %v1465_v36, 0.0 }
  0xb4   : > { %966 = vmatmul.msk.f32.gmra.mxu0 %vm335_vm1, %v326_v38  ;;  %980 = vmatmul.msk.f32.gmra.mxu1 %vm335_vm1, %v326_v38 }
  0xb5   : > { %994 = vmatmul.msk.f32.gmra.mxu2 %vm335_vm1, %v326_v38  ;;  %1008 = vmatmul.msk.f32.gmra.mxu3 %vm335_vm1, %v326_v38 }
  0xbc   : > { %967 = vmatmul.msk.f32.gmra.mxu0 %vm335_vm1, %v327_v41  ;;  %981 = vmatmul.msk.f32.gmra.mxu1 %vm335_vm1, %v327_v41 }
  0xbd   : > { %995 = vmatmul.msk.f32.gmra.mxu2 %vm335_vm1, %v327_v41  ;;  %1009 = vmatmul.msk.f32.gmra.mxu3 %vm335_vm1, %v327_v41 }
  0xc4   : > { %968 = vmatmul.msk.f32.gmra.mxu0 %vm335_vm1, %v328_v46  ;;  %982 = vmatmul.msk.f32.gmra.mxu1 %vm335_vm1, %v328_v46 }
  0xc5   : > { %996 = vmatmul.msk.f32.gmra.mxu2 %vm335_vm1, %v328_v46  ;;  %1010 = vmatmul.msk.f32.gmra.mxu3 %vm335_vm1, %v328_v46 }
  0xcc   : > { %969 = vmatmul.msk.f32.gmra.mxu0 %vm335_vm1, %v329_v49  ;;  %983 = vmatmul.msk.f32.gmra.mxu1 %vm335_vm1, %v329_v49 }
  0xcd   : > { %997 = vmatmul.msk.f32.gmra.mxu2 %vm335_vm1, %v329_v49  ;;  %1011 = vmatmul.msk.f32.gmra.mxu3 %vm335_vm1, %v329_v49 }
  0xd4   : > { %1021 = vmatmul.msk.f32.vlgmr.msrb.gmra.mxu0 %vm335_vm1, %v613_v50  ;;  %1035 = vmatmul.msk.f32.vlgmr.msrb.gmra.mxu1 %vm335_vm1, %v613_v50 }
  0xd5   : > { %1049 = vmatmul.msk.f32.vlgmr.msrb.gmra.mxu2 %vm335_vm1, %v613_v50  ;;  %1063 = vmatmul.msk.f32.vlgmr.msrb.gmra.mxu3 %vm335_vm1, %v613_v50 }
  0xdc   : > { %1022 = vmatmul.msk.f32.gmra.mxu0 %vm335_vm1, %v614_v51  ;;  %1036 = vmatmul.msk.f32.gmra.mxu1 %vm335_vm1, %v614_v51 }
  0xdd   : > { %1050 = vmatmul.msk.f32.gmra.mxu2 %vm335_vm1, %v614_v51  ;;  %1064 = vmatmul.msk.f32.gmra.mxu3 %vm335_vm1, %v614_v51 }
  0xe4   : > { %1023 = vmatmul.msk.f32.gmra.mxu0 %vm335_vm1, %v615_v52  ;;  %1037 = vmatmul.msk.f32.gmra.mxu1 %vm335_vm1, %v615_v52 }
  0xe5   : > { %1051 = vmatmul.msk.f32.gmra.mxu2 %vm335_vm1, %v615_v52  ;;  %1065 = vmatmul.msk.f32.gmra.mxu3 %vm335_vm1, %v615_v52 }
  0xec   : > { %1024 = vmatmul.msk.f32.gmra.mxu0 %vm335_vm1, %v616_v53  ;;  %1038 = vmatmul.msk.f32.gmra.mxu1 %vm335_vm1, %v616_v53 }
  0xed   : > { %1052 = vmatmul.msk.f32.gmra.mxu2 %vm335_vm1, %v616_v53  ;;  %1066 = vmatmul.msk.f32.gmra.mxu3 %vm335_vm1, %v616_v53 }
  0xf4   : > { %1025 = vmatmul.msk.f32.gmra.mxu0 %vm335_vm1, %v617_v43  ;;  %1039 = vmatmul.msk.f32.gmra.mxu1 %vm335_vm1, %v617_v43 }
  0xf5   : > { %1053 = vmatmul.msk.f32.gmra.mxu2 %vm335_vm1, %v617_v43  ;;  %1067 = vmatmul.msk.f32.gmra.mxu3 %vm335_vm1, %v617_v43 }
  0xfc   : > { %1026 = vmatmul.msk.f32.gmra.mxu0 %vm335_vm1, %v618_v54  ;;  %1040 = vmatmul.msk.f32.gmra.mxu1 %vm335_vm1, %v618_v54 }
  0xfd   : > { %1054 = vmatmul.msk.f32.gmra.mxu2 %vm335_vm1, %v618_v54  ;;  %1068 = vmatmul.msk.f32.gmra.mxu3 %vm335_vm1, %v618_v54 }
 0x104   : > { %1027 = vmatmul.msk.f32.gmra.mxu0 %vm335_vm1, %v619_v55  ;;  %1041 = vmatmul.msk.f32.gmra.mxu1 %vm335_vm1, %v619_v55 }
 0x105   : > { %1055 = vmatmul.msk.f32.gmra.mxu2 %vm335_vm1, %v619_v55  ;;  %1069 = vmatmul.msk.f32.gmra.mxu3 %vm335_vm1, %v619_v55 }
 0x10c   : > { %1028 = vmatmul.msk.f32.gmra.mxu0 %vm335_vm1, %v620_v56  ;;  %1042 = vmatmul.msk.f32.gmra.mxu1 %vm335_vm1, %v620_v56 }
 0x10d   : > { %1056 = vmatmul.msk.f32.gmra.mxu2 %vm335_vm1, %v620_v56  ;;  %1070 = vmatmul.msk.f32.gmra.mxu3 %vm335_vm1, %v620_v56 }
 0x111   : > { %v381_v57 = vpop.f32.mrf.mxu0  ;;  %v431_v58 = vpop.f32.mrf.mxu1 }
 0x112   : > { %v555_v61 = vmax.f32 %v381_v57, %v431_v58 }
 0x118   : > { %v481_v59 = vpop.f32.mrf.mxu2  ;;  %v531_v60 = vpop.f32.mrf.mxu3 }
 0x119   : > { %v563_v62 = vmax.f32 %v481_v59, %v531_v60  ;;  %v384_v63 = vpop.f32.mrf.mxu0  ;;  %v434_v0 = vpop.f32.mrf.mxu1 }
 0x11a   : > { %v556_v4 = vmax.f32 %v384_v63, %v434_v0 }
 0x11b   : > { %v571_v1 = vmax.f32 %v555_v61, %v563_v62 }
 0x11d   : > { %580 = vst.msk [vmem:[%s1530_s30] sm:$0xff] %vm579_vm2, %v571_v1 }
 0x120   : > { %v484_v2 = vpop.f32.mrf.mxu2  ;;  %v534_v3 = vpop.f32.mrf.mxu3 }
 0x121   : > { %v564_v5 = vmax.f32 %v484_v2, %v534_v3  ;;  %v387_v6 = vpop.f32.mrf.mxu0  ;;  %v437_v7 = vpop.f32.mrf.mxu1 }
 0x122   : > { %v557_v11 = vmax.f32 %v387_v6, %v437_v7 }
 0x123   : > { %v572_v8 = vmax.f32 %v556_v4, %v564_v5 }
 0x125   : > { %581 = vst.msk [vmem:[%s1530_s30 + $0x8] sm:$0xff] %vm579_vm2, %v572_v8 }
 0x128   : > { %v487_v9 = vpop.f32.mrf.mxu2  ;;  %v537_v10 = vpop.f32.mrf.mxu3 }
 0x129   : > { %v565_v12 = vmax.f32 %v487_v9, %v537_v10  ;;  %v390_v13 = vpop.f32.mrf.mxu0  ;;  %v440_v14 = vpop.f32.mrf.mxu1 }
 0x12a   : > { %v558_v18 = vmax.f32 %v390_v13, %v440_v14 }
 0x12b   : > { %v573_v15 = vmax.f32 %v557_v11, %v565_v12 }
 0x12d   : > { %582 = vst.msk [vmem:[%s1530_s30 + $0x10] sm:$0xff] %vm579_vm2, %v573_v15 }
 0x130   : > { %v490_v16 = vpop.f32.mrf.mxu2  ;;  %v540_v17 = vpop.f32.mrf.mxu3 }
 0x131   : > { %v566_v19 = vmax.f32 %v490_v16, %v540_v17  ;;  %v393_v20 = vpop.f32.mrf.mxu0  ;;  %v443_v21 = vpop.f32.mrf.mxu1 }
 0x132   : > { %v559_v25 = vmax.f32 %v393_v20, %v443_v21 }
 0x133   : > { %v574_v22 = vmax.f32 %v558_v18, %v566_v19 }
 0x135   : > { %583 = vst.msk [vmem:[%s1530_s30 + $0x18] sm:$0xff] %vm579_vm2, %v574_v22 }
 0x138   : > { %v493_v23 = vpop.f32.mrf.mxu2  ;;  %v543_v24 = vpop.f32.mrf.mxu3 }
 0x139   : > { %v567_v26 = vmax.f32 %v493_v23, %v543_v24  ;;  %v396_v27 = vpop.f32.mrf.mxu0  ;;  %v446_v28 = vpop.f32.mrf.mxu1 }
 0x13a   : > { %v560_v32 = vmax.f32 %v396_v27, %v446_v28 }
 0x13b   : > { %v575_v29 = vmax.f32 %v559_v25, %v567_v26 }
 0x13d   : > { %584 = vst.msk [vmem:[%s1530_s30 + $0x20] sm:$0xff] %vm579_vm2, %v575_v29 }
 0x140   : > { %v496_v30 = vpop.f32.mrf.mxu2  ;;  %v546_v31 = vpop.f32.mrf.mxu3 }
 0x141   : > { %v568_v33 = vmax.f32 %v496_v30, %v546_v31  ;;  %v399_v34 = vpop.f32.mrf.mxu0  ;;  %v449_v35 = vpop.f32.mrf.mxu1 }
 0x142   : > { %v561_v39 = vmax.f32 %v399_v34, %v449_v35 }
 0x143   : > { %v576_v36 = vmax.f32 %v560_v32, %v568_v33 }
 0x145   : > { %585 = vst.msk [vmem:[%s1530_s30 + $0x28] sm:$0xff] %vm579_vm2, %v576_v36 }
 0x148   : > { %v499_v37 = vpop.f32.mrf.mxu2  ;;  %v549_v38 = vpop.f32.mrf.mxu3 }
 0x149   : > { %v569_v40 = vmax.f32 %v499_v37, %v549_v38  ;;  %v402_v41 = vpop.f32.mrf.mxu0  ;;  %v452_v42 = vpop.f32.mrf.mxu1 }
 0x14a   : > { %v562_v47 = vmax.f32 %v402_v41, %v452_v42 }
 0x14b   : > { %v577_v44 = vmax.f32 %v561_v39, %v569_v40 }
 0x14d   : > { %586 = vst.msk [vmem:[%s1530_s30 + $0x30] sm:$0xff] %vm579_vm2, %v577_v44 }
 0x150   : > { %v502_v45 = vpop.f32.mrf.mxu2  ;;  %v552_v46 = vpop.f32.mrf.mxu3 }
 0x151   : > { %v570_v48 = vmax.f32 %v502_v45, %v552_v46  ;;  %v670_v49 = vpop.f32.mrf.mxu0  ;;  %v719_v50 = vpop.f32.mrf.mxu1 }
 0x152   : > { %v841_v43 = vmax.f32 %v670_v49, %v719_v50 }
 0x153   : > { %v578_v51 = vmax.f32 %v562_v47, %v570_v48 }
 0x155   : > { %587 = vst.msk [vmem:[%s1530_s30 + $0x38] sm:$0xff] %vm579_vm2, %v578_v51 }
 0x158   : > { %v768_v52 = vpop.f32.mrf.mxu2  ;;  %v817_v53 = vpop.f32.mrf.mxu3 }
 0x159   : > { %v849_v54 = vmax.f32 %v768_v52, %v817_v53  ;;  %v673_v55 = vpop.f32.mrf.mxu0  ;;  %v722_v56 = vpop.f32.mrf.mxu1 }
 0x15a   : > { %v842_v60 = vmax.f32 %v673_v55, %v722_v56 }
 0x15b   : > { %v857_v57 = vmax.f32 %v841_v43, %v849_v54 }
 0x15d   : > { %1071 = vst.msk [vmem:[%s1530_s30 + $0x40] sm:$0xff] %vm579_vm2, %v857_v57 }
 0x160   : > { %v771_v58 = vpop.f32.mrf.mxu2  ;;  %v820_v59 = vpop.f32.mrf.mxu3 }
 0x161   : > { %v850_v61 = vmax.f32 %v771_v58, %v820_v59  ;;  %v676_v62 = vpop.f32.mrf.mxu0  ;;  %v725_v63 = vpop.f32.mrf.mxu1 }
 0x162   : > { %v843_v3 = vmax.f32 %v676_v62, %v725_v63 }
 0x163   : > { %v858_v0 = vmax.f32 %v842_v60, %v850_v61 }
 0x165   : > { %1072 = vst.msk [vmem:[%s1530_s30 + $0x48] sm:$0xff] %vm579_vm2, %v858_v0 }
 0x168   : > { %v774_v1 = vpop.f32.mrf.mxu2  ;;  %v823_v2 = vpop.f32.mrf.mxu3 }
 0x169   : > { %v851_v4 = vmax.f32 %v774_v1, %v823_v2  ;;  %v679_v5 = vpop.f32.mrf.mxu0  ;;  %v728_v6 = vpop.f32.mrf.mxu1 }
 0x16a   : > { %v844_v10 = vmax.f32 %v679_v5, %v728_v6 }
 0x16b   : > { %v859_v7 = vmax.f32 %v843_v3, %v851_v4 }
 0x16d   : > { %1073 = vst.msk [vmem:[%s1530_s30 + $0x50] sm:$0xff] %vm579_vm2, %v859_v7 }
 0x170   : > { %v777_v8 = vpop.f32.mrf.mxu2  ;;  %v826_v9 = vpop.f32.mrf.mxu3 }
 0x171   : > { %v852_v11 = vmax.f32 %v777_v8, %v826_v9  ;;  %v682_v12 = vpop.f32.mrf.mxu0  ;;  %v731_v13 = vpop.f32.mrf.mxu1 }
 0x172   : > { %v845_v17 = vmax.f32 %v682_v12, %v731_v13 }
 0x173   : > { %v860_v14 = vmax.f32 %v844_v10, %v852_v11 }
 0x175   : > { %1074 = vst.msk [vmem:[%s1530_s30 + $0x58] sm:$0xff] %vm579_vm2, %v860_v14 }
 0x178   : > { %v780_v15 = vpop.f32.mrf.mxu2  ;;  %v829_v16 = vpop.f32.mrf.mxu3 }
 0x179   : > { %v853_v18 = vmax.f32 %v780_v15, %v829_v16  ;;  %v685_v19 = vpop.f32.mrf.mxu0  ;;  %v734_v20 = vpop.f32.mrf.mxu1 }
 0x17a   : > { %v846_v24 = vmax.f32 %v685_v19, %v734_v20 }
 0x17b   : > { %v861_v21 = vmax.f32 %v845_v17, %v853_v18 }
 0x17d   : > { %1075 = vst.msk [vmem:[%s1530_s30 + $0x60] sm:$0xff] %vm579_vm2, %v861_v21 }
 0x180   : > { %v783_v22 = vpop.f32.mrf.mxu2  ;;  %v832_v23 = vpop.f32.mrf.mxu3 }
 0x181   : > { %v854_v25 = vmax.f32 %v783_v22, %v832_v23  ;;  %v688_v27 = vpop.f32.mrf.mxu0  ;;  %v737_v28 = vpop.f32.mrf.mxu1 }
 0x182   : > { %v847_v31 = vmax.f32 %v688_v27, %v737_v28 }
 0x183   : > { %v862_v26 = vmax.f32 %v846_v24, %v854_v25 }
 0x185   : > { %1076 = vst.msk [vmem:[%s1530_s30 + $0x68] sm:$0xff] %vm579_vm2, %v862_v26 }
 0x188   : > { %v786_v29 = vpop.f32.mrf.mxu2  ;;  %v835_v30 = vpop.f32.mrf.mxu3 }
 0x189   : > { %v855_v32 = vmax.f32 %v786_v29, %v835_v30  ;;  %v691_v34 = vpop.f32.mrf.mxu0  ;;  %v740_v35 = vpop.f32.mrf.mxu1 }
 0x18a   : > { %v848_v38 = vmax.f32 %v691_v34, %v740_v35 }
 0x18b   : > { %v863_v33 = vmax.f32 %v847_v31, %v855_v32 }
 0x18d   : > { %1077 = vst.msk [vmem:[%s1530_s30 + $0x70] sm:$0xff] %vm579_vm2, %v863_v33 }
 0x190   : > { %v789_v36 = vpop.f32.mrf.mxu2  ;;  %v838_v37 = vpop.f32.mrf.mxu3 }
 0x191   : > { %v856_v39 = vmax.f32 %v789_v36, %v838_v37 }
 0x193   : > { %v864_v40 = vmax.f32 %v848_v38, %v856_v39 }
 0x195   : > { %1078 = vst.msk [vmem:[%s1530_s30 + $0x78] sm:$0xff] %vm579_vm2, %v864_v40 }
 0x196   : > { %1160 = shalt.err (!%p1157_p3)
}
 0x197   : > { %s1198_s28 = smov 128   ;;  %s1199_s10 = smov 8  }
 0x198   : > { %1088 = dma.vmem_to_hbm [thread:$0]  (%p1263_p5), %s889_s22, 2048, %s891_s9, %s875_s19, %s1198_s28, %s1198_s28, %s1199_s10  }
 0x199 PF: > { %p1094_p4 = scmp.ge.s32.totalorder %s1195_s18, 2  ;;  %s905_s29 = sand.u32 1, %s1183_s15  }
 0x19a   : > { %s906_s30 = scalar_lea.sflag [#allocation3], %s905_s29 }
 0x19b   : > { %p1091_p7 = pnand %p1094_p4, %p1267_p6 }
 0x19d   : > { %p1092_p8 = pneg %p1091_p7 }
 0x19f   : > { %1178 = dma.done.wait (%p1092_p8), %s906_s30, 2048  }
 0x1a0   : > { %1180 = vsyncadd (%p1092_p8), %s906_s30, 4294965248  ;;  %p14_p9 = scmp.ge.s32.totalorder %s1250_s21, 4   ;;  %s1605_s15 = smov %s1187_s16 }
 0x1a1   : > { %s1606_s16 = smov %s1191_s17  ;;  %s1607_s17 = smov %s1261_s24 }
 0x1a2   : > { %s1608_s18 = smov %s1250_s21  ;;  %16 = sbr.rel (!%p14_p9) target bundleno = 3 (0x3), region = 76 }
 0x1a7   :  { %912 = vsyncpa [#allocation3], 1 }
 0x1a8   :  { %914 = vsyncpa [#allocation3 + $0x1], 1 }

</bundles_post_ra>
